<compile_context>
chip_gen: v6e
topology: v6e:2x2x1
jax: 0.10.0
libtpu: 0.0.40
codegen_flags: <defaults>
</compile_context>

<pallas_src>
import functools
import numpy as np
import jax
import jax.numpy as jnp
from jax.experimental import pallas as pl
from jax.experimental.pallas import tpu as pltpu

THRESH = 0.5
BN_EPS = 1e-5
CONV_DTYPE = jnp.bfloat16   # MXU operand dtype (f32 accumulation); LIF/BN stay f32
NUM_TENSORCORES = 1         # set to 2 on megacore (v7x) parts so each 'parallel'
                            # grid axis has an even, >=2 step count per chip


def _pick_chunk(n, cap, align=1):
    """Largest divisor of n that is <= cap, is a multiple of `align` (or the
    full extent n), and leaves a step count divisible by NUM_TENSORCORES."""
    cand = [d for d in range(1, n + 1)
            if n % d == 0 and d <= cap and (d % align == 0 or d == n)]
    if not cand:
        cand = [d for d in range(1, n + 1) if n % d == 0 and d <= cap]
    pref = [d for d in cand if (n // d) % NUM_TENSORCORES == 0]
    return max(pref) if pref else max(cand)


# ---------------------------------------------------------------------------
# LIF step (BaseNeuron.mem_update, act=False) shared by all kernels
# ---------------------------------------------------------------------------

def _lif_step(mem_ref, x, decay, t):
    """mem_0 = x_0;  mem_t = mem_{t-1}*sigmoid(decay)*(1-spike_{t-1}) + x_t,
    spike_{t-1} = mem_{t-1} > thresh (recomputed from the unclamped membrane).
    Returns clamp(mem_t, 0, 1) (LIAF act=False output)."""
    @pl.when(t == 0)
    def _():
        mem_ref[...] = x

    @pl.when(t > 0)
    def _():
        prev = mem_ref[...]
        mem_ref[...] = prev * jnp.where(prev > THRESH, 0.0, decay) + x

    return jnp.clip(mem_ref[...], 0.0, 1.0)


# ---------------------------------------------------------------------------
# 3x3 'same' conv (one MXU matmul) + BN partial statistics, in-kernel helper
# ---------------------------------------------------------------------------

def _conv3x3_emit(x2d, w_ref, y_ref, st_ref, *, hh, wco, wcop):
    """x2d: (M = bc*H, W*Cin) f32 block of images stacked along the sublane
    axis.  One matmul against the lane-concatenated banded weight [T0|T1|T2]
    (each tap padded to a 128-lane multiple -> aligned slices), then the two
    off-row taps are applied with one sublane roll over the fused M axis; the
    rows leaked across image boundaries are exactly the rows zeroed by the
    (iota % H) padding masks.  Also writes this block's BN partials
    (per-lane mean, centered M2)."""
    m = x2d.shape[0]
    a = jnp.dot(x2d.astype(w_ref.dtype), w_ref[...],
                preferred_element_type=jnp.float32)          # (M, 3*wcop)
    a0 = a[:, 0:wco]                                          # kh = 0 tap
    a1 = a[:, wcop:wcop + wco]                                # kh = 1 tap
    a2 = a[:, 2 * wcop:2 * wcop + wco]                        # kh = 2 tap
    hrow = jax.lax.broadcasted_iota(jnp.int32, (m, wco), 0) % hh
    not_top = (hrow > 0).astype(jnp.float32)                  # zero-pad above image
    not_bot = (hrow < hh - 1).astype(jnp.float32)             # zero-pad below image
    acc = (a1
           + not_top * pltpu.roll(a0, 1, 0)                   # tap from row h-1
           + not_bot * pltpu.roll(a2, m - 1, 0))              # tap from row h+1
    y_ref[0] = acc
    mean_b = jnp.sum(acc, axis=0, keepdims=True) * (1.0 / m)
    ctr = acc - mean_b
    st_ref[0, 0:1, :] = mean_b
    st_ref[0, 1:2, :] = jnp.sum(ctr * ctr, axis=0, keepdims=True)


# ---------------------------------------------------------------------------
# Stage A: LIF (cv1.mem_update) + conv1 + BN1 partials
# ---------------------------------------------------------------------------

def _lif_conv_kernel(d_ref, x_ref, w_ref, y_ref, st_ref, mem, *, hh, wco, wcop):
    t = pl.program_id(1)
    lif_out = _lif_step(mem, x_ref[0], d_ref[0], t)   # cv1.mem_update (decay1)
    _conv3x3_emit(lif_out, w_ref, y_ref, st_ref, hh=hh, wco=wco, wcop=wcop)


def lif_conv_bnstats(x_tm, decay, w_cat, wco, hh, bc):
    """x_tm: (T, B*H, W*Cin).  Returns conv1 output (T, B*H, W*Cout) and BN
    partial stats (bsteps*T, 2, W*Cout)."""
    t, bh, wci = x_tm.shape
    m = bc * hh
    wcop = w_cat.shape[1] // 3
    bsteps = bh // m
    y, stats = pl.pallas_call(
        functools.partial(_lif_conv_kernel, hh=hh, wco=wco, wcop=wcop),
        out_shape=(jax.ShapeDtypeStruct((t, bh, wco), jnp.float32),
                   jax.ShapeDtypeStruct((bsteps * t, 2, wco), jnp.float32)),
        grid_spec=pltpu.PrefetchScalarGridSpec(
            num_scalar_prefetch=0,
            grid=(bsteps, t),
            in_specs=[
                pl.BlockSpec(memory_space=pltpu.MemorySpace.SMEM),
                pl.BlockSpec((1, m, wci), lambda bb, tt: (tt, bb, 0)),
                pl.BlockSpec((wci, 3 * wcop), lambda bb, tt: (0, 0)),
            ],
            out_specs=[
                pl.BlockSpec((1, m, wco), lambda bb, tt: (tt, bb, 0)),
                pl.BlockSpec((1, 2, wco), lambda bb, tt: (bb * t + tt, 0, 0)),
            ],
            scratch_shapes=[pltpu.VMEM((m, wci), jnp.float32)],
        ),
        compiler_params=pltpu.CompilerParams(
            dimension_semantics=("parallel", "arbitrary")),
    )(decay.reshape(1).astype(jnp.float32), x_tm, w_cat)
    return y, stats


# ---------------------------------------------------------------------------
# Stage B: BN1 + LIF(d1) + LIF(d2) + conv2 + BN2 partials
# ---------------------------------------------------------------------------

def _bnlif2_conv_kernel(d_ref, x_ref, s_ref, b_ref, w_ref, y_ref, st_ref,
                        mem1, mem2, *, hh, wco, wcop):
    t = pl.program_id(1)
    xbn = x_ref[0] * s_ref[...] + b_ref[...]          # fused BN1 normalize
    out1 = _lif_step(mem1, xbn, d_ref[0], t)          # cv1 internal LIF (d1)
    out2 = _lif_step(mem2, out1, d_ref[1], t)         # cv2.mem_update  (d2)
    _conv3x3_emit(out2, w_ref, y_ref, st_ref, hh=hh, wco=wco, wcop=wcop)


def bnlif2_conv_bnstats(y1, scale_wc, off_wc, d1, d2, w_cat, wco, hh, bc):
    t, bh, _ = y1.shape
    m = bc * hh
    wcop = w_cat.shape[1] // 3
    bsteps = bh // m
    dd = jnp.stack([d1, d2]).reshape(2).astype(jnp.float32)
    y, stats = pl.pallas_call(
        functools.partial(_bnlif2_conv_kernel, hh=hh, wco=wco, wcop=wcop),
        out_shape=(jax.ShapeDtypeStruct((t, bh, wco), jnp.float32),
                   jax.ShapeDtypeStruct((bsteps * t, 2, wco), jnp.float32)),
        grid_spec=pltpu.PrefetchScalarGridSpec(
            num_scalar_prefetch=0,
            grid=(bsteps, t),
            in_specs=[
                pl.BlockSpec(memory_space=pltpu.MemorySpace.SMEM),
                pl.BlockSpec((1, m, wco), lambda bb, tt: (tt, bb, 0)),
                pl.BlockSpec((1, wco), lambda bb, tt: (0, 0)),
                pl.BlockSpec((1, wco), lambda bb, tt: (0, 0)),
                pl.BlockSpec((wco, 3 * wcop), lambda bb, tt: (0, 0)),
            ],
            out_specs=[
                pl.BlockSpec((1, m, wco), lambda bb, tt: (tt, bb, 0)),
                pl.BlockSpec((1, 2, wco), lambda bb, tt: (bb * t + tt, 0, 0)),
            ],
            scratch_shapes=[pltpu.VMEM((m, wco), jnp.float32),
                            pltpu.VMEM((m, wco), jnp.float32)],
        ),
        compiler_params=pltpu.CompilerParams(
            dimension_semantics=("parallel", "arbitrary")),
    )(dd, y1, scale_wc, off_wc, w_cat)
    return y, stats


# ---------------------------------------------------------------------------
# Stage C: BN2 + LIF(d2) + identity shortcut, lane-dense (rows, 128) layout
# ---------------------------------------------------------------------------

def _bn_lif_res_kernel(d_ref, x_ref, s_ref, b_ref, r_ref, o_ref, mem1):
    t = pl.program_id(1)
    xbn = x_ref[0] * s_ref[...] + b_ref[...]          # fused BN2 normalize
    o_ref[0] = _lif_step(mem1, xbn, d_ref[0], t) + r_ref[0]   # + shortcut


def bn_lif_res_pass(y_flat, scale128, off128, decay, res_flat, rows_cap=4096):
    t, r, _ = y_flat.shape
    rc = _pick_chunk(r, rows_cap, align=8)            # (8,128) sublane rule
    out = pl.pallas_call(
        _bn_lif_res_kernel,
        out_shape=jax.ShapeDtypeStruct((t, r, 128), jnp.float32),
        grid_spec=pltpu.PrefetchScalarGridSpec(
            num_scalar_prefetch=0,
            grid=(r // rc, t),
            in_specs=[
                pl.BlockSpec(memory_space=pltpu.MemorySpace.SMEM),
                pl.BlockSpec((1, rc, 128), lambda rr, tt: (tt, rr, 0)),
                pl.BlockSpec((1, 128), lambda rr, tt: (0, 0)),
                pl.BlockSpec((1, 128), lambda rr, tt: (0, 0)),
                pl.BlockSpec((1, rc, 128), lambda rr, tt: (tt, rr, 0)),
            ],
            out_specs=pl.BlockSpec((1, rc, 128), lambda rr, tt: (tt, rr, 0)),
            scratch_shapes=[pltpu.VMEM((rc, 128), jnp.float32)],
        ),
        compiler_params=pltpu.CompilerParams(
            dimension_semantics=("parallel", "arbitrary")),
    )(decay.reshape(1).astype(jnp.float32), y_flat, scale128, off128, res_flat)
    return out


# ---------------------------------------------------------------------------
# JAX glue
# ---------------------------------------------------------------------------

def bn_channel_affine(stats, gamma, beta, n_part, c, eps=BN_EPS):
    """Combine per-(batch-chunk, timestep) per-lane BN partials (mean, M2)
    into per-channel scale/offset for training-mode BatchNorm3d.  All partials
    have the same count (n_part values per lane), so
        grand_mean = mean(part_means)
        total_M2   = sum(part_M2) + n_part * sum((part_mean - grand_mean)^2)
    exactly - no sumsq - mean^2 cancellation."""
    pm = stats[:, 0, :].reshape(-1, c)               # (P*W, C) partial means
    m2 = stats[:, 1, :].reshape(-1, c)               # (P*W, C) partial M2
    mean = jnp.mean(pm, axis=0)
    tot = jnp.sum(m2, axis=0) + n_part * jnp.sum((pm - mean) ** 2, axis=0)
    var = tot / (pm.shape[0] * n_part)               # biased variance
    scale = gamma * jax.lax.rsqrt(var + eps)
    offset = beta - mean * scale
    return scale, offset


def liaf_resblock_lif_forward(x_bcthw, params, conv_block_bytes=4 << 20,
                              rows_cap=4096):
    b, c, t, h, w = x_bcthw.shape
    cout = params["w1"].shape[0]
    assert c == cout, "identity-shortcut path only (see header TODO)"
    assert 128 % cout == 0 and (b * h * w * cout) % 128 == 0 and h % 8 == 0

    # (B, C, T, H, W) -> (T, B*H, W*C)
    x = jnp.transpose(x_bcthw, (2, 0, 3, 4, 1)).astype(jnp.float32).reshape(
        t, b * h, w * c)
    d1 = jax.nn.sigmoid(params["decay1"]).astype(jnp.float32)
    d2 = jax.nn.sigmoid(params["decay2"]).astype(jnp.float32)

    wco = w * cout
    cap_imgs = max(1, conv_block_bytes // (h * w * c * 4))
    bc = _pick_chunk(b, cap_imgs)          # images per conv grid step
    n_part = bc * h                        # values per lane per BN partial

    # 1) cv1.mem_update (LIF d1) fused with conv1 (3x3, bias dropped) + BN1 stats
    y1, st1 = lif_conv_bnstats(x, d1, params["wcat1"], wco, h, bc)
    s1, o1 = bn_channel_affine(st1, params["bn1_g"], params["bn1_b"], n_part, cout)

    # 2) BN1 + cv1 internal LIF (d1) + cv2.mem_update (d2) fused with conv2 + BN2 stats
    y2, st2 = bnlif2_conv_bnstats(
        y1, jnp.tile(s1, w).reshape(1, wco), jnp.tile(o1, w).reshape(1, wco),
        d1, d2, params["wcat2"], wco, h, bc)
    s2, o2 = bn_channel_affine(st2, params["bn2_g"], params["bn2_b"], n_part, cout)

    # 3) BN2 + cv2 internal LIF (d2) + identity shortcut, lane-dense (rows,128)
    r = (b * h * wco) // 128
    out = bn_lif_res_pass(
        y2.reshape(t, r, 128),
        jnp.tile(s2, 128 // cout).reshape(1, 128),
        jnp.tile(o2, 128 // cout).reshape(1, 128),
        d2, x.reshape(t, r, 128), rows_cap)

    return jnp.transpose(out.reshape(t, b, h, w, cout), (1, 4, 0, 2, 3))


def _build_row_toeplitz(w_oihw, width, dtype=CONV_DTYPE):
    """Lane-concatenated per-kh banded weight over the fused (W, C) lane axis:
    column block r (padded to a 128-lane multiple) holds
      mat[wi*Cin+ci, r*wcop + wo*Cout+co] = w[co, ci, r, wi-wo+1] inside the band.
    W-direction zero padding is encoded by the band; the kh (row) shift is a
    sublane roll in-kernel.  Stored in the MXU operand dtype (bf16 by default).
    # TODO(synk): for large Cin/Cout (W*C*... exceeding the 32/64 MiB VMEM
    # budget on v7x), switch to per-(kh,kw) (Cin,Cout) matmuls with
    # lane-shifted inputs instead of the W-fold weight replication."""
    cout, cin, kh, kw = w_oihw.shape
    assert kh == 3 and kw == 3
    wco = width * cout
    wcop = ((wco + 127) // 128) * 128          # 128-aligned tap stride
    wn = np.asarray(w_oihw, np.float32)
    mat = np.zeros((width * cin, 3 * wcop), np.float32)
    for r in range(3):
        for s in range(3):
            blk = wn[:, :, r, s].T             # (Cin, Cout)
            for wo in range(width):
                wi = wo + s - 1
                if 0 <= wi < width:
                    mat[wi * cin:(wi + 1) * cin,
                        r * wcop + wo * cout: r * wcop + (wo + 1) * cout] = blk
    return jnp.asarray(mat, dtype)


def init_params(key, cin, cout, width, conv_dtype=CONV_DTYPE):
    k1, k2 = jax.random.split(key)
    std1 = float(np.sqrt(2.0 / (cin * 9)))     # kaiming_normal_ (fan_in)
    std2 = float(np.sqrt(2.0 / (cout * 9)))
    w1 = jax.random.normal(k1, (cout, cin, 3, 3), jnp.float32) * std1
    w2 = jax.random.normal(k2, (cout, cout, 3, 3), jnp.float32) * std2
    return dict(
        w1=w1, w2=w2,
        wcat1=_build_row_toeplitz(w1, width, conv_dtype),
        wcat2=_build_row_toeplitz(w2, width, conv_dtype),
        # paramInit: conv bias = 0.5 (reference only; cancelled exactly by BN)
        b1=jnp.full((cout,), 0.5, jnp.float32),
        b2=jnp.full((cout,), 0.5, jnp.float32),
        bn1_g=jnp.ones((cout,), jnp.float32), bn1_b=jnp.zeros((cout,), jnp.float32),
        bn2_g=jnp.ones((cout,), jnp.float32), bn2_b=jnp.zeros((cout,), jnp.float32),
        decay1=jnp.float32(0.5), decay2=jnp.float32(0.5),
    )


# ---------------------------------------------------------------------------
# Pure-JAX reference (structural sanity check; uses the same MXU operand dtype)
# ---------------------------------------------------------------------------

def _ref_mem_update(x_bcthw, decay, thresh=THRESH):
    d = jax.nn.sigmoid(decay)
    tw = x_bcthw.shape[2]
    outs, mem_old, spike = [], None, None
    for t in range(tw):
        xt = x_bcthw[:, :, t]
        mem = xt if t == 0 else mem_old * d * (1.0 - spike) + xt
        mem_old = mem
        spike = (mem_old > thresh).astype(jnp.float32)
        outs.append(mem_old)
    return jnp.clip(jnp.stack(outs, axis=2), 0.0, 1.0)


def _ref_conv_bn(x_bcthw, wgt, bias, gamma, beta, eps=BN_EPS):
    bsz, cin, tw, h, ww = x_bcthw.shape
    cout = wgt.shape[0]
    xt = jnp.transpose(x_bcthw, (0, 2, 1, 3, 4)).reshape(bsz * tw, cin, h, ww)
    y = jax.lax.conv_general_dilated(
        xt.astype(CONV_DTYPE), wgt.astype(CONV_DTYPE), (1, 1), ((1, 1), (1, 1)),
        dimension_numbers=("NCHW", "OIHW", "NCHW"),
        preferred_element_type=jnp.float32) + bias.reshape(1, cout, 1, 1)
    y = jnp.transpose(y.reshape(bsz, tw, cout, h, ww), (0, 2, 1, 3, 4))
    mean = jnp.mean(y, axis=(0, 2, 3, 4), keepdims=True)
    var = jnp.mean((y - mean) ** 2, axis=(0, 2, 3, 4), keepdims=True)
    return ((y - mean) * jax.lax.rsqrt(var + eps)
            * gamma.reshape(1, cout, 1, 1, 1) + beta.reshape(1, cout, 1, 1, 1))


def ref_forward(x_bcthw, params):
    cv1_in = _ref_mem_update(x_bcthw, params["decay1"])
    cv1_out = _ref_mem_update(
        _ref_conv_bn(cv1_in, params["w1"], params["b1"],
                     params["bn1_g"], params["bn1_b"]), params["decay1"])
    cv2_in = _ref_mem_update(cv1_out, params["decay2"])
    cv2_out = _ref_mem_update(
        _ref_conv_bn(cv2_in, params["w2"], params["b2"],
                     params["bn2_g"], params["bn2_b"]), params["decay2"])
    return cv2_out + x_bcthw


# ---------------------------------------------------------------------------

if __name__ == "__main__":
    B, C, T, H, W = 2, 4, 8, 16, 16   # inChannels == outChannels -> identity shortcut
    key = jax.random.PRNGKey(0)
    kx, kp = jax.random.split(key)
    x = jax.random.normal(kx, (B, C, T, H, W), jnp.float32)
    params = init_params(kp, C, C, W)
    # Exercise the decay / per-channel BN-affine plumbing with non-degenerate
    # (but valid) parameter values; both implementations use them identically.
    params["decay1"] = jnp.float32(0.3)
    params["decay2"] = jnp.float32(0.8)
    params["bn1_g"] = 1.0 + 0.10 * jnp.arange(C, dtype=jnp.float32)
    params["bn1_b"] = 0.05 * jnp.arange(C, dtype=jnp.float32)
    params["bn2_g"] = 1.0 - 0.05 * jnp.arange(C, dtype=jnp.float32)
    params["bn2_b"] = -0.03 * jnp.arange(C, dtype=jnp.float32)

    fwd = jax.jit(liaf_resblock_lif_forward)
    out = jax.block_until_ready(fwd(x, params))
    assert out.shape == (B, C, T, H, W) and out.dtype == jnp.float32

    ref = jax.block_until_ready(ref_forward(x, params))
    # Both pipelines use bf16 MXU operands with f32 accumulation; residual
    # differences are accumulation-order level plus rare spike-threshold flips.
    frac_close = float(jnp.mean((jnp.abs(out - ref) < 2e-2).astype(jnp.float32)))
    assert frac_close > 0.99, f"mismatch vs pure-JAX reference: frac_close={frac_close}"

    print("KERNEL_OK")
</pallas_src>

<mosaic_0001>
module attributes {stable_mosaic.version = 11 : i64} {
  func.func @_lif_conv_kernel(%arg0: i32, %arg1: i32, %arg2: memref<1xf32, #tpu.memory_space<smem>>, %arg3: memref<1x32x64xf32, #tpu.memory_space<vmem>>, %arg4: memref<64x384xbf16, #tpu.memory_space<vmem>>, %arg5: memref<1x32x64xf32, #tpu.memory_space<vmem>>, %arg6: memref<1x2x64xf32, #tpu.memory_space<vmem>>, %arg7: memref<32x64xf32, #tpu.memory_space<vmem>>) attributes {dimension_semantics = [#tpu.dimension_semantics<parallel>, #tpu.dimension_semantics<arbitrary>], iteration_bounds = array<i64: 1, 8>, scalar_prefetch = 0 : i64, scratch_operands = 1 : i64, tpu.core_type = #tpu.core_type<tc>, window_params = [{transform_indices = @transform_0, window_bounds = array<i64: 1>}, {transform_indices = @transform_1, window_bounds = array<i64: 1, 32, 64>}, {pipeline_mode = #tpu.pipeline_mode<synchronous>, transform_indices = @transform_2, window_bounds = array<i64: 64, 384>}, {transform_indices = @transform_3, window_bounds = array<i64: 1, 32, 64>}, {transform_indices = @transform_4, window_bounds = array<i64: 1, 2, 64>}]} {
    %c0 = arith.constant 0 : index
    %c0_0 = arith.constant 0 : index
    %c0_1 = arith.constant 0 : index
    %0 = vector.load %arg3[%c0, %c0_0, %c0_1] : memref<1x32x64xf32, #tpu.memory_space<vmem>>, vector<1x32x64xf32>
    %1 = vector.shape_cast %0 : vector<1x32x64xf32> to vector<32x64xf32>
    %c0_2 = arith.constant 0 : index
    %2 = memref.load %arg2[%c0_2] : memref<1xf32, #tpu.memory_space<smem>>
    %c0_i32 = arith.constant 0 : i32
    %3 = arith.cmpi eq, %arg1, %c0_i32 : i32
    %4 = arith.extui %3 : i1 to i32
    %c0_i32_3 = arith.constant 0 : i32
    %5 = arith.cmpi ne, %4, %c0_i32_3 : i32
    scf.if %5 {
      %c0_29 = arith.constant 0 : index
      %c0_30 = arith.constant 0 : index
      %69 = vector.load %arg7[%c0_29, %c0_30] : memref<32x64xf32, #tpu.memory_space<vmem>>, vector<32x64xf32>
      tpu.vector_store %arg7[%c0_29, %c0_30], %1 {strides = array<i32>} : memref<32x64xf32, #tpu.memory_space<vmem>>, vector<32x64xf32>,
    } else {
    }
    %c0_i32_4 = arith.constant 0 : i32
    %6 = arith.cmpi sgt, %arg1, %c0_i32_4 : i32
    %7 = arith.extui %6 : i1 to i32
    %c0_i32_5 = arith.constant 0 : i32
    %8 = arith.cmpi ne, %7, %c0_i32_5 : i32
    scf.if %8 {
      %c0_29 = arith.constant 0 : index
      %c0_30 = arith.constant 0 : index
      %69 = vector.load %arg7[%c0_29, %c0_30] : memref<32x64xf32, #tpu.memory_space<vmem>>, vector<32x64xf32>
      %cst_31 = arith.constant 5.000000e-01 : f32
      %70 = vector.broadcast %cst_31 : f32 to vector<32x64xf32>
      %71 = arith.cmpf ogt, %69, %70 : vector<32x64xf32>
      %cst_32 = arith.constant 0.000000e+00 : f32
      %72 = vector.broadcast %cst_32 : f32 to vector<32x64xf32>
      %73 = vector.broadcast %2 : f32 to vector<32x64xf32>
      %74 = arith.select %71, %72, %73 : vector<32x64xi1>, vector<32x64xf32>
      %75 = arith.mulf %69, %74 : vector<32x64xf32>
      %76 = arith.addf %75, %1 : vector<32x64xf32>
      %c0_33 = arith.constant 0 : index
      %c0_34 = arith.constant 0 : index
      %77 = vector.load %arg7[%c0_33, %c0_34] : memref<32x64xf32, #tpu.memory_space<vmem>>, vector<32x64xf32>
      tpu.vector_store %arg7[%c0_33, %c0_34], %76 {strides = array<i32>} : memref<32x64xf32, #tpu.memory_space<vmem>>, vector<32x64xf32>,
    } else {
    }
    %c0_6 = arith.constant 0 : index
    %c0_7 = arith.constant 0 : index
    %9 = vector.load %arg7[%c0_6, %c0_7] : memref<32x64xf32, #tpu.memory_space<vmem>>, vector<32x64xf32>
    %cst = arith.constant 0.000000e+00 : f32
    %cst_8 = arith.constant 1.000000e+00 : f32
    %10 = vector.broadcast %cst : f32 to vector<32x64xf32>
    %11 = arith.maximumf %10, %9 : vector<32x64xf32>
    %12 = vector.broadcast %cst_8 : f32 to vector<32x64xf32>
    %13 = arith.minimumf %12, %11 : vector<32x64xf32>
    %14 = arith.truncf %13 : vector<32x64xf32> to vector<32x64xbf16>
    %c0_9 = arith.constant 0 : index
    %c0_10 = arith.constant 0 : index
    %15 = vector.load %arg4[%c0_9, %c0_10] : memref<64x384xbf16, #tpu.memory_space<vmem>>, vector<64x384xbf16>
    %cst_11 = arith.constant dense<0.000000e+00> : vector<32x384xf32>
    %16 = tpu.matmul %14, %15, %cst_11 {dimension_numbers = #tpu.dot_dimension_numbers<[1], [0], [0], [1], [0, 0, 1, 1], [], []>} : vector<32x64xbf16>, vector<64x384xbf16>, vector<32x384xf32> -> vector<32x384xf32>
    %17 = vector.extract_strided_slice %16 {offsets = [0, 0], sizes = [32, 64], strides = [1, 1]} : vector<32x384xf32> to vector<32x64xf32>
    %18 = vector.extract_strided_slice %16 {offsets = [0, 128], sizes = [32, 64], strides = [1, 1]} : vector<32x384xf32> to vector<32x64xf32>
    %19 = vector.extract_strided_slice %16 {offsets = [0, 256], sizes = [32, 64], strides = [1, 1]} : vector<32x384xf32> to vector<32x64xf32>
    %20 = tpu.iota {dimensions = array<i32: 0>} : vector<32x64xi32>
    %c16_i32 = arith.constant 16 : i32
    %c0_i32_12 = arith.constant 0 : i32
    %21 = arith.cmpi eq, %c16_i32, %c0_i32_12 : i32
    %c1_i32 = arith.constant 1 : i32
    %22 = arith.select %21, %c1_i32, %c16_i32 : i32
    %23 = vector.broadcast %22 : i32 to vector<32x64xi32>
    %24 = arith.remsi %20, %23 : vector<32x64xi32>
    %c0_i32_13 = arith.constant 0 : i32
    %25 = vector.broadcast %c0_i32_13 : i32 to vector<32x64xi32>
    %26 = arith.cmpi ne, %24, %25 : vector<32x64xi32>
    %c0_i32_14 = arith.constant 0 : i32
    %27 = vector.broadcast %c0_i32_14 : i32 to vector<32x64xi32>
    %28 = arith.cmpi slt, %24, %27 : vector<32x64xi32>
    %c0_i32_15 = arith.constant 0 : i32
    %29 = arith.cmpi slt, %22, %c0_i32_15 : i32
    %30 = vector.broadcast %29 : i1 to vector<32x64xi1>
    %31 = vector.broadcast %30 : vector<32x64xi1> to vector<32x64xi1>
    %32 = arith.xori %28, %31 : vector<32x64xi1>
    %33 = arith.andi %32, %26 : vector<32x64xi1>
    %34 = vector.broadcast %22 : i32 to vector<32x64xi32>
    %35 = arith.addi %24, %34 : vector<32x64xi32>
    %36 = arith.select %33, %35, %24 : vector<32x64xi1>, vector<32x64xi32>
    %c0_i32_16 = arith.constant 0 : i32
    %37 = vector.broadcast %c0_i32_16 : i32 to vector<32x64xi32>
    %38 = arith.cmpi sgt, %36, %37 : vector<32x64xi32>
    %39 = arith.extui %38 : vector<32x64xi1> to vector<32x64xi32>
    %40 = arith.sitofp %39 : vector<32x64xi32> to vector<32x64xf32>
    %c15_i32 = arith.constant 15 : i32
    %41 = vector.broadcast %c15_i32 : i32 to vector<32x64xi32>
    %42 = arith.cmpi slt, %36, %41 : vector<32x64xi32>
    %43 = arith.extui %42 : vector<32x64xi1> to vector<32x64xi32>
    %44 = arith.sitofp %43 : vector<32x64xi32> to vector<32x64xf32>
    %c1_i32_17 = arith.constant 1 : i32
    %45 = tpu.dynamic_rotate %17 by %c1_i32_17 dim 0 : vector<32x64xf32>, i32 -> vector<32x64xf32>
    %46 = arith.mulf %40, %45 : vector<32x64xf32>
    %47 = arith.addf %18, %46 : vector<32x64xf32>
    %c31_i32 = arith.constant 31 : i32
    %48 = tpu.dynamic_rotate %19 by %c31_i32 dim 0 : vector<32x64xf32>, i32 -> vector<32x64xf32>
    %49 = arith.mulf %44, %48 : vector<32x64xf32>
    %50 = arith.addf %47, %49 : vector<32x64xf32>
    %c0_18 = arith.constant 0 : index
    %c0_19 = arith.constant 0 : index
    %c0_20 = arith.constant 0 : index
    %51 = vector.load %arg5[%c0_18, %c0_19, %c0_20] : memref<1x32x64xf32, #tpu.memory_space<vmem>>, vector<1x32x64xf32>
    %52 = vector.shape_cast %51 : vector<1x32x64xf32> to vector<32x64xf32>
    %53 = vector.shape_cast %50 : vector<32x64xf32> to vector<1x32x64xf32>
    tpu.vector_store %arg5[%c0_18, %c0_19, %c0_20], %53 {strides = array<i32>} : memref<1x32x64xf32, #tpu.memory_space<vmem>>, vector<1x32x64xf32>,
    %cst_21 = arith.constant dense<0.000000e+00> : vector<64xf32>
    %54 = vector.multi_reduction <add>, %50, %cst_21 [0] : vector<32x64xf32> to vector<64xf32>
    %55 = vector.shape_cast %54 : vector<64xf32> to vector<1x64xf32>
    %cst_22 = arith.constant 3.125000e-02 : f32
    %56 = vector.broadcast %cst_22 : f32 to vector<1x64xf32>
    %57 = arith.mulf %55, %56 : vector<1x64xf32>
    %58 = vector.broadcast %57 : vector<1x64xf32> to vector<32x64xf32>
    %59 = arith.subf %50, %58 : vector<32x64xf32>
    %c0_23 = arith.constant 0 : index
    %c0_24 = arith.constant 0 : index
    %c0_25 = arith.constant 0 : index
    %60 = vector.load %arg6[%c0_23, %c0_24, %c0_25] : memref<1x2x64xf32, #tpu.memory_space<vmem>>, vector<1x1x64xf32>
    %61 = vector.shape_cast %60 : vector<1x1x64xf32> to vector<1x64xf32>
    %62 = vector.shape_cast %57 : vector<1x64xf32> to vector<1x1x64xf32>
    tpu.vector_store %arg6[%c0_23, %c0_24, %c0_25], %62 {strides = array<i32>} : memref<1x2x64xf32, #tpu.memory_space<vmem>>, vector<1x1x64xf32>,
    %63 = arith.mulf %59, %59 : vector<32x64xf32>
    %cst_26 = arith.constant dense<0.000000e+00> : vector<64xf32>
    %64 = vector.multi_reduction <add>, %63, %cst_26 [0] : vector<32x64xf32> to vector<64xf32>
    %65 = vector.shape_cast %64 : vector<64xf32> to vector<1x64xf32>
    %c0_27 = arith.constant 0 : index
    %c1 = arith.constant 1 : index
    %c0_28 = arith.constant 0 : index
    %66 = vector.load %arg6[%c0_27, %c1, %c0_28] : memref<1x2x64xf32, #tpu.memory_space<vmem>>, vector<1x1x64xf32>
    %67 = vector.shape_cast %66 : vector<1x1x64xf32> to vector<1x64xf32>
    %68 = vector.shape_cast %65 : vector<1x64xf32> to vector<1x1x64xf32>
    tpu.vector_store %arg6[%c0_27, %c1, %c0_28], %68 {strides = array<i32>} : memref<1x2x64xf32, #tpu.memory_space<vmem>>, vector<1x1x64xf32>,
    return
  }
  func.func @transform_0(%arg0: i32, %arg1: i32) -> i32 {
    %c0_i32 = arith.constant 0 : i32
    %c0_i32_0 = arith.constant 0 : i32
    return %c0_i32 : i32
  }
  func.func @transform_1(%arg0: i32, %arg1: i32) -> (i32, i32, i32) {
    %c0_i32 = arith.constant 0 : i32
    %c0_i32_0 = arith.constant 0 : i32
    return %arg1, %arg0, %c0_i32 : i32, i32, i32
  }
  func.func @transform_2(%arg0: i32, %arg1: i32) -> (i32, i32) {
    %c0_i32 = arith.constant 0 : i32
    %c0_i32_0 = arith.constant 0 : i32
    %c0_i32_1 = arith.constant 0 : i32
    return %c0_i32, %c0_i32_0 : i32, i32
  }
  func.func @transform_3(%arg0: i32, %arg1: i32) -> (i32, i32, i32) {
    %c0_i32 = arith.constant 0 : i32
    %c0_i32_0 = arith.constant 0 : i32
    return %arg1, %arg0, %c0_i32 : i32, i32, i32
  }
  func.func @transform_4(%arg0: i32, %arg1: i32) -> (i32, i32, i32) {
    %c8_i32 = arith.constant 8 : i32
    %0 = arith.muli %arg0, %c8_i32 : i32
    %1 = arith.addi %0, %arg1 : i32
    %c0_i32 = arith.constant 0 : i32
    %c0_i32_0 = arith.constant 0 : i32
    %c0_i32_1 = arith.constant 0 : i32
    return %1, %c0_i32, %c0_i32_0 : i32, i32, i32
  }
}

module attributes {stable_mosaic.version = 11 : i64} {
  func.func @_bnlif2_conv_kernel(%arg0: i32, %arg1: i32, %arg2: memref<2xf32, #tpu.memory_space<smem>>, %arg3: memref<1x32x64xf32, #tpu.memory_space<vmem>>, %arg4: memref<1x64xf32, #tpu.memory_space<vmem>>, %arg5: memref<1x64xf32, #tpu.memory_space<vmem>>, %arg6: memref<64x384xbf16, #tpu.memory_space<vmem>>, %arg7: memref<1x32x64xf32, #tpu.memory_space<vmem>>, %arg8: memref<1x2x64xf32, #tpu.memory_space<vmem>>, %arg9: memref<32x64xf32, #tpu.memory_space<vmem>>, %arg10: memref<32x64xf32, #tpu.memory_space<vmem>>) attributes {dimension_semantics = [#tpu.dimension_semantics<parallel>, #tpu.dimension_semantics<arbitrary>], iteration_bounds = array<i64: 1, 8>, scalar_prefetch = 0 : i64, scratch_operands = 2 : i64, tpu.core_type = #tpu.core_type<tc>, window_params = [{transform_indices = @transform_0, window_bounds = array<i64: 2>}, {transform_indices = @transform_1, window_bounds = array<i64: 1, 32, 64>}, {pipeline_mode = #tpu.pipeline_mode<synchronous>, transform_indices = @transform_2, window_bounds = array<i64: 1, 64>}, {pipeline_mode = #tpu.pipeline_mode<synchronous>, transform_indices = @transform_3, window_bounds = array<i64: 1, 64>}, {pipeline_mode = #tpu.pipeline_mode<synchronous>, transform_indices = @transform_4, window_bounds = array<i64: 64, 384>}, {transform_indices = @transform_5, window_bounds = array<i64: 1, 32, 64>}, {transform_indices = @transform_6, window_bounds = array<i64: 1, 2, 64>}]} {
    %c0 = arith.constant 0 : index
    %c0_0 = arith.constant 0 : index
    %c0_1 = arith.constant 0 : index
    %0 = vector.load %arg3[%c0, %c0_0, %c0_1] : memref<1x32x64xf32, #tpu.memory_space<vmem>>, vector<1x32x64xf32>
    %1 = vector.shape_cast %0 : vector<1x32x64xf32> to vector<32x64xf32>
    %c0_2 = arith.constant 0 : index
    %c0_3 = arith.constant 0 : index
    %2 = vector.load %arg4[%c0_2, %c0_3] : memref<1x64xf32, #tpu.memory_space<vmem>>, vector<1x64xf32>
    %3 = vector.broadcast %2 : vector<1x64xf32> to vector<32x64xf32>
    %4 = arith.mulf %1, %3 : vector<32x64xf32>
    %c0_4 = arith.constant 0 : index
    %c0_5 = arith.constant 0 : index
    %5 = vector.load %arg5[%c0_4, %c0_5] : memref<1x64xf32, #tpu.memory_space<vmem>>, vector<1x64xf32>
    %6 = vector.broadcast %5 : vector<1x64xf32> to vector<32x64xf32>
    %7 = arith.addf %4, %6 : vector<32x64xf32>
    %c0_6 = arith.constant 0 : index
    %8 = memref.load %arg2[%c0_6] : memref<2xf32, #tpu.memory_space<smem>>
    %c0_i32 = arith.constant 0 : i32
    %9 = arith.cmpi eq, %arg1, %c0_i32 : i32
    %10 = arith.extui %9 : i1 to i32
    %c0_i32_7 = arith.constant 0 : i32
    %11 = arith.cmpi ne, %10, %c0_i32_7 : i32
    scf.if %11 {
      %c0_42 = arith.constant 0 : index
      %c0_43 = arith.constant 0 : index
      %87 = vector.load %arg9[%c0_42, %c0_43] : memref<32x64xf32, #tpu.memory_space<vmem>>, vector<32x64xf32>
      tpu.vector_store %arg9[%c0_42, %c0_43], %7 {strides = array<i32>} : memref<32x64xf32, #tpu.memory_space<vmem>>, vector<32x64xf32>,
    } else {
    }
    %c0_i32_8 = arith.constant 0 : i32
    %12 = arith.cmpi sgt, %arg1, %c0_i32_8 : i32
    %13 = arith.extui %12 : i1 to i32
    %c0_i32_9 = arith.constant 0 : i32
    %14 = arith.cmpi ne, %13, %c0_i32_9 : i32
    scf.if %14 {
      %c0_42 = arith.constant 0 : index
      %c0_43 = arith.constant 0 : index
      %87 = vector.load %arg9[%c0_42, %c0_43] : memref<32x64xf32, #tpu.memory_space<vmem>>, vector<32x64xf32>
      %cst_44 = arith.constant 5.000000e-01 : f32
      %88 = vector.broadcast %cst_44 : f32 to vector<32x64xf32>
      %89 = arith.cmpf ogt, %87, %88 : vector<32x64xf32>
      %cst_45 = arith.constant 0.000000e+00 : f32
      %90 = vector.broadcast %cst_45 : f32 to vector<32x64xf32>
      %91 = vector.broadcast %8 : f32 to vector<32x64xf32>
      %92 = arith.select %89, %90, %91 : vector<32x64xi1>, vector<32x64xf32>
      %93 = arith.mulf %87, %92 : vector<32x64xf32>
      %94 = arith.addf %93, %7 : vector<32x64xf32>
      %c0_46 = arith.constant 0 : index
      %c0_47 = arith.constant 0 : index
      %95 = vector.load %arg9[%c0_46, %c0_47] : memref<32x64xf32, #tpu.memory_space<vmem>>, vector<32x64xf32>
      tpu.vector_store %arg9[%c0_46, %c0_47], %94 {strides = array<i32>} : memref<32x64xf32, #tpu.memory_space<vmem>>, vector<32x64xf32>,
    } else {
    }
    %c0_10 = arith.constant 0 : index
    %c0_11 = arith.constant 0 : index
    %15 = vector.load %arg9[%c0_10, %c0_11] : memref<32x64xf32, #tpu.memory_space<vmem>>, vector<32x64xf32>
    %cst = arith.constant 0.000000e+00 : f32
    %cst_12 = arith.constant 1.000000e+00 : f32
    %16 = vector.broadcast %cst : f32 to vector<32x64xf32>
    %17 = arith.maximumf %16, %15 : vector<32x64xf32>
    %18 = vector.broadcast %cst_12 : f32 to vector<32x64xf32>
    %19 = arith.minimumf %18, %17 : vector<32x64xf32>
    %c1 = arith.constant 1 : index
    %20 = memref.load %arg2[%c1] : memref<2xf32, #tpu.memory_space<smem>>
    %c0_i32_13 = arith.constant 0 : i32
    %21 = arith.cmpi eq, %arg1, %c0_i32_13 : i32
    %22 = arith.extui %21 : i1 to i32
    %c0_i32_14 = arith.constant 0 : i32
    %23 = arith.cmpi ne, %22, %c0_i32_14 : i32
    scf.if %23 {
      %c0_42 = arith.constant 0 : index
      %c0_43 = arith.constant 0 : index
      %87 = vector.load %arg10[%c0_42, %c0_43] : memref<32x64xf32, #tpu.memory_space<vmem>>, vector<32x64xf32>
      tpu.vector_store %arg10[%c0_42, %c0_43], %19 {strides = array<i32>} : memref<32x64xf32, #tpu.memory_space<vmem>>, vector<32x64xf32>,
    } else {
    }
    %c0_i32_15 = arith.constant 0 : i32
    %24 = arith.cmpi sgt, %arg1, %c0_i32_15 : i32
    %25 = arith.extui %24 : i1 to i32
    %c0_i32_16 = arith.constant 0 : i32
    %26 = arith.cmpi ne, %25, %c0_i32_16 : i32
    scf.if %26 {
      %c0_42 = arith.constant 0 : index
      %c0_43 = arith.constant 0 : index
      %87 = vector.load %arg10[%c0_42, %c0_43] : memref<32x64xf32, #tpu.memory_space<vmem>>, vector<32x64xf32>
      %cst_44 = arith.constant 5.000000e-01 : f32
      %88 = vector.broadcast %cst_44 : f32 to vector<32x64xf32>
      %89 = arith.cmpf ogt, %87, %88 : vector<32x64xf32>
      %cst_45 = arith.constant 0.000000e+00 : f32
      %90 = vector.broadcast %cst_45 : f32 to vector<32x64xf32>
      %91 = vector.broadcast %20 : f32 to vector<32x64xf32>
      %92 = arith.select %89, %90, %91 : vector<32x64xi1>, vector<32x64xf32>
      %93 = arith.mulf %87, %92 : vector<32x64xf32>
      %94 = arith.addf %93, %19 : vector<32x64xf32>
      %c0_46 = arith.constant 0 : index
      %c0_47 = arith.constant 0 : index
      %95 = vector.load %arg10[%c0_46, %c0_47] : memref<32x64xf32, #tpu.memory_space<vmem>>, vector<32x64xf32>
      tpu.vector_store %arg10[%c0_46, %c0_47], %94 {strides = array<i32>} : memref<32x64xf32, #tpu.memory_space<vmem>>, vector<32x64xf32>,
    } else {
    }
    %c0_17 = arith.constant 0 : index
    %c0_18 = arith.constant 0 : index
    %27 = vector.load %arg10[%c0_17, %c0_18] : memref<32x64xf32, #tpu.memory_space<vmem>>, vector<32x64xf32>
    %cst_19 = arith.constant 0.000000e+00 : f32
    %cst_20 = arith.constant 1.000000e+00 : f32
    %28 = vector.broadcast %cst_19 : f32 to vector<32x64xf32>
    %29 = arith.maximumf %28, %27 : vector<32x64xf32>
    %30 = vector.broadcast %cst_20 : f32 to vector<32x64xf32>
    %31 = arith.minimumf %30, %29 : vector<32x64xf32>
    %32 = arith.truncf %31 : vector<32x64xf32> to vector<32x64xbf16>
    %c0_21 = arith.constant 0 : index
    %c0_22 = arith.constant 0 : index
    %33 = vector.load %arg6[%c0_21, %c0_22] : memref<64x384xbf16, #tpu.memory_space<vmem>>, vector<64x384xbf16>
    %cst_23 = arith.constant dense<0.000000e+00> : vector<32x384xf32>
    %34 = tpu.matmul %32, %33, %cst_23 {dimension_numbers = #tpu.dot_dimension_numbers<[1], [0], [0], [1], [0, 0, 1, 1], [], []>} : vector<32x64xbf16>, vector<64x384xbf16>, vector<32x384xf32> -> vector<32x384xf32>
    %35 = vector.extract_strided_slice %34 {offsets = [0, 0], sizes = [32, 64], strides = [1, 1]} : vector<32x384xf32> to vector<32x64xf32>
    %36 = vector.extract_strided_slice %34 {offsets = [0, 128], sizes = [32, 64], strides = [1, 1]} : vector<32x384xf32> to vector<32x64xf32>
    %37 = vector.extract_strided_slice %34 {offsets = [0, 256], sizes = [32, 64], strides = [1, 1]} : vector<32x384xf32> to vector<32x64xf32>
    %38 = tpu.iota {dimensions = array<i32: 0>} : vector<32x64xi32>
    %c16_i32 = arith.constant 16 : i32
    %c0_i32_24 = arith.constant 0 : i32
    %39 = arith.cmpi eq, %c16_i32, %c0_i32_24 : i32
    %c1_i32 = arith.constant 1 : i32
    %40 = arith.select %39, %c1_i32, %c16_i32 : i32
    %41 = vector.broadcast %40 : i32 to vector<32x64xi32>
    %42 = arith.remsi %38, %41 : vector<32x64xi32>
    %c0_i32_25 = arith.constant 0 : i32
    %43 = vector.broadcast %c0_i32_25 : i32 to vector<32x64xi32>
    %44 = arith.cmpi ne, %42, %43 : vector<32x64xi32>
    %c0_i32_26 = arith.constant 0 : i32
    %45 = vector.broadcast %c0_i32_26 : i32 to vector<32x64xi32>
    %46 = arith.cmpi slt, %42, %45 : vector<32x64xi32>
    %c0_i32_27 = arith.constant 0 : i32
    %47 = arith.cmpi slt, %40, %c0_i32_27 : i32
    %48 = vector.broadcast %47 : i1 to vector<32x64xi1>
    %49 = vector.broadcast %48 : vector<32x64xi1> to vector<32x64xi1>
    %50 = arith.xori %46, %49 : vector<32x64xi1>
    %51 = arith.andi %50, %44 : vector<32x64xi1>
    %52 = vector.broadcast %40 : i32 to vector<32x64xi32>
    %53 = arith.addi %42, %52 : vector<32x64xi32>
    %54 = arith.select %51, %53, %42 : vector<32x64xi1>, vector<32x64xi32>
    %c0_i32_28 = arith.constant 0 : i32
    %55 = vector.broadcast %c0_i32_28 : i32 to vector<32x64xi32>
    %56 = arith.cmpi sgt, %54, %55 : vector<32x64xi32>
    %57 = arith.extui %56 : vector<32x64xi1> to vector<32x64xi32>
    %58 = arith.sitofp %57 : vector<32x64xi32> to vector<32x64xf32>
    %c15_i32 = arith.constant 15 : i32
    %59 = vector.broadcast %c15_i32 : i32 to vector<32x64xi32>
    %60 = arith.cmpi slt, %54, %59 : vector<32x64xi32>
    %61 = arith.extui %60 : vector<32x64xi1> to vector<32x64xi32>
    %62 = arith.sitofp %61 : vector<32x64xi32> to vector<32x64xf32>
    %c1_i32_29 = arith.constant 1 : i32
    %63 = tpu.dynamic_rotate %35 by %c1_i32_29 dim 0 : vector<32x64xf32>, i32 -> vector<32x64xf32>
    %64 = arith.mulf %58, %63 : vector<32x64xf32>
    %65 = arith.addf %36, %64 : vector<32x64xf32>
    %c31_i32 = arith.constant 31 : i32
    %66 = tpu.dynamic_rotate %37 by %c31_i32 dim 0 : vector<32x64xf32>, i32 -> vector<32x64xf32>
    %67 = arith.mulf %62, %66 : vector<32x64xf32>
    %68 = arith.addf %65, %67 : vector<32x64xf32>
    %c0_30 = arith.constant 0 : index
    %c0_31 = arith.constant 0 : index
    %c0_32 = arith.constant 0 : index
    %69 = vector.load %arg7[%c0_30, %c0_31, %c0_32] : memref<1x32x64xf32, #tpu.memory_space<vmem>>, vector<1x32x64xf32>
    %70 = vector.shape_cast %69 : vector<1x32x64xf32> to vector<32x64xf32>
    %71 = vector.shape_cast %68 : vector<32x64xf32> to vector<1x32x64xf32>
    tpu.vector_store %arg7[%c0_30, %c0_31, %c0_32], %71 {strides = array<i32>} : memref<1x32x64xf32, #tpu.memory_space<vmem>>, vector<1x32x64xf32>,
    %cst_33 = arith.constant dense<0.000000e+00> : vector<64xf32>
    %72 = vector.multi_reduction <add>, %68, %cst_33 [0] : vector<32x64xf32> to vector<64xf32>
    %73 = vector.shape_cast %72 : vector<64xf32> to vector<1x64xf32>
    %cst_34 = arith.constant 3.125000e-02 : f32
    %74 = vector.broadcast %cst_34 : f32 to vector<1x64xf32>
    %75 = arith.mulf %73, %74 : vector<1x64xf32>
    %76 = vector.broadcast %75 : vector<1x64xf32> to vector<32x64xf32>
    %77 = arith.subf %68, %76 : vector<32x64xf32>
    %c0_35 = arith.constant 0 : index
    %c0_36 = arith.constant 0 : index
    %c0_37 = arith.constant 0 : index
    %78 = vector.load %arg8[%c0_35, %c0_36, %c0_37] : memref<1x2x64xf32, #tpu.memory_space<vmem>>, vector<1x1x64xf32>
    %79 = vector.shape_cast %78 : vector<1x1x64xf32> to vector<1x64xf32>
    %80 = vector.shape_cast %75 : vector<1x64xf32> to vector<1x1x64xf32>
    tpu.vector_store %arg8[%c0_35, %c0_36, %c0_37], %80 {strides = array<i32>} : memref<1x2x64xf32, #tpu.memory_space<vmem>>, vector<1x1x64xf32>,
    %81 = arith.mulf %77, %77 : vector<32x64xf32>
    %cst_38 = arith.constant dense<0.000000e+00> : vector<64xf32>
    %82 = vector.multi_reduction <add>, %81, %cst_38 [0] : vector<32x64xf32> to vector<64xf32>
    %83 = vector.shape_cast %82 : vector<64xf32> to vector<1x64xf32>
    %c0_39 = arith.constant 0 : index
    %c1_40 = arith.constant 1 : index
    %c0_41 = arith.constant 0 : index
    %84 = vector.load %arg8[%c0_39, %c1_40, %c0_41] : memref<1x2x64xf32, #tpu.memory_space<vmem>>, vector<1x1x64xf32>
    %85 = vector.shape_cast %84 : vector<1x1x64xf32> to vector<1x64xf32>
    %86 = vector.shape_cast %83 : vector<1x64xf32> to vector<1x1x64xf32>
    tpu.vector_store %arg8[%c0_39, %c1_40, %c0_41], %86 {strides = array<i32>} : memref<1x2x64xf32, #tpu.memory_space<vmem>>, vector<1x1x64xf32>,
    return
  }
  func.func @transform_0(%arg0: i32, %arg1: i32) -> i32 {
    %c0_i32 = arith.constant 0 : i32
    %c0_i32_0 = arith.constant 0 : i32
    return %c0_i32 : i32
  }
  func.func @transform_1(%arg0: i32, %arg1: i32) -> (i32, i32, i32) {
    %c0_i32 = arith.constant 0 : i32
    %c0_i32_0 = arith.constant 0 : i32
    return %arg1, %arg0, %c0_i32 : i32, i32, i32
  }
  func.func @transform_2(%arg0: i32, %arg1: i32) -> (i32, i32) {
    %c0_i32 = arith.constant 0 : i32
    %c0_i32_0 = arith.constant 0 : i32
    %c0_i32_1 = arith.constant 0 : i32
    return %c0_i32, %c0_i32_0 : i32, i32
  }
  func.func @transform_3(%arg0: i32, %arg1: i32) -> (i32, i32) {
    %c0_i32 = arith.constant 0 : i32
    %c0_i32_0 = arith.constant 0 : i32
    %c0_i32_1 = arith.constant 0 : i32
    return %c0_i32, %c0_i32_0 : i32, i32
  }
  func.func @transform_4(%arg0: i32, %arg1: i32) -> (i32, i32) {
    %c0_i32 = arith.constant 0 : i32
    %c0_i32_0 = arith.constant 0 : i32
    %c0_i32_1 = arith.constant 0 : i32
    return %c0_i32, %c0_i32_0 : i32, i32
  }
  func.func @transform_5(%arg0: i32, %arg1: i32) -> (i32, i32, i32) {
    %c0_i32 = arith.constant 0 : i32
    %c0_i32_0 = arith.constant 0 : i32
    return %arg1, %arg0, %c0_i32 : i32, i32, i32
  }
  func.func @transform_6(%arg0: i32, %arg1: i32) -> (i32, i32, i32) {
    %c8_i32 = arith.constant 8 : i32
    %0 = arith.muli %arg0, %c8_i32 : i32
    %1 = arith.addi %0, %arg1 : i32
    %c0_i32 = arith.constant 0 : i32
    %c0_i32_0 = arith.constant 0 : i32
    %c0_i32_1 = arith.constant 0 : i32
    return %1, %c0_i32, %c0_i32_0 : i32, i32, i32
  }
}

module attributes {stable_mosaic.version = 11 : i64} {
  func.func @_bn_lif_res_kernel(%arg0: i32, %arg1: i32, %arg2: memref<1xf32, #tpu.memory_space<smem>>, %arg3: memref<1x16x128xf32, #tpu.memory_space<vmem>>, %arg4: memref<1x128xf32, #tpu.memory_space<vmem>>, %arg5: memref<1x128xf32, #tpu.memory_space<vmem>>, %arg6: memref<1x16x128xf32, #tpu.memory_space<vmem>>, %arg7: memref<1x16x128xf32, #tpu.memory_space<vmem>>, %arg8: memref<16x128xf32, #tpu.memory_space<vmem>>) attributes {dimension_semantics = [#tpu.dimension_semantics<parallel>, #tpu.dimension_semantics<arbitrary>], iteration_bounds = array<i64: 1, 8>, scalar_prefetch = 0 : i64, scratch_operands = 1 : i64, tpu.core_type = #tpu.core_type<tc>, window_params = [{transform_indices = @transform_0, window_bounds = array<i64: 1>}, {transform_indices = @transform_1, window_bounds = array<i64: 1, 16, 128>}, {pipeline_mode = #tpu.pipeline_mode<synchronous>, transform_indices = @transform_2, window_bounds = array<i64: 1, 128>}, {pipeline_mode = #tpu.pipeline_mode<synchronous>, transform_indices = @transform_3, window_bounds = array<i64: 1, 128>}, {transform_indices = @transform_4, window_bounds = array<i64: 1, 16, 128>}, {transform_indices = @transform_5, window_bounds = array<i64: 1, 16, 128>}]} {
    %c0 = arith.constant 0 : index
    %c0_0 = arith.constant 0 : index
    %c0_1 = arith.constant 0 : index
    %0 = vector.load %arg3[%c0, %c0_0, %c0_1] : memref<1x16x128xf32, #tpu.memory_space<vmem>>, vector<1x16x128xf32>
    %1 = vector.shape_cast %0 : vector<1x16x128xf32> to vector<16x128xf32>
    %c0_2 = arith.constant 0 : index
    %c0_3 = arith.constant 0 : index
    %2 = vector.load %arg4[%c0_2, %c0_3] : memref<1x128xf32, #tpu.memory_space<vmem>>, vector<1x128xf32>
    %3 = vector.broadcast %2 : vector<1x128xf32> to vector<16x128xf32>
    %4 = arith.mulf %1, %3 : vector<16x128xf32>
    %c0_4 = arith.constant 0 : index
    %c0_5 = arith.constant 0 : index
    %5 = vector.load %arg5[%c0_4, %c0_5] : memref<1x128xf32, #tpu.memory_space<vmem>>, vector<1x128xf32>
    %6 = vector.broadcast %5 : vector<1x128xf32> to vector<16x128xf32>
    %7 = arith.addf %4, %6 : vector<16x128xf32>
    %c0_6 = arith.constant 0 : index
    %8 = memref.load %arg2[%c0_6] : memref<1xf32, #tpu.memory_space<smem>>
    %c0_i32 = arith.constant 0 : i32
    %9 = arith.cmpi eq, %arg1, %c0_i32 : i32
    %10 = arith.extui %9 : i1 to i32
    %c0_i32_7 = arith.constant 0 : i32
    %11 = arith.cmpi ne, %10, %c0_i32_7 : i32
    scf.if %11 {
      %c0_19 = arith.constant 0 : index
      %c0_20 = arith.constant 0 : index
      %26 = vector.load %arg8[%c0_19, %c0_20] : memref<16x128xf32, #tpu.memory_space<vmem>>, vector<16x128xf32>
      tpu.vector_store %arg8[%c0_19, %c0_20], %7 {strides = array<i32>} : memref<16x128xf32, #tpu.memory_space<vmem>>, vector<16x128xf32>,
    } else {
    }
    %c0_i32_8 = arith.constant 0 : i32
    %12 = arith.cmpi sgt, %arg1, %c0_i32_8 : i32
    %13 = arith.extui %12 : i1 to i32
    %c0_i32_9 = arith.constant 0 : i32
    %14 = arith.cmpi ne, %13, %c0_i32_9 : i32
    scf.if %14 {
      %c0_19 = arith.constant 0 : index
      %c0_20 = arith.constant 0 : index
      %26 = vector.load %arg8[%c0_19, %c0_20] : memref<16x128xf32, #tpu.memory_space<vmem>>, vector<16x128xf32>
      %cst_21 = arith.constant 5.000000e-01 : f32
      %27 = vector.broadcast %cst_21 : f32 to vector<16x128xf32>
      %28 = arith.cmpf ogt, %26, %27 : vector<16x128xf32>
      %cst_22 = arith.constant 0.000000e+00 : f32
      %29 = vector.broadcast %cst_22 : f32 to vector<16x128xf32>
      %30 = vector.broadcast %8 : f32 to vector<16x128xf32>
      %31 = arith.select %28, %29, %30 : vector<16x128xi1>, vector<16x128xf32>
      %32 = arith.mulf %26, %31 : vector<16x128xf32>
      %33 = arith.addf %32, %7 : vector<16x128xf32>
      %c0_23 = arith.constant 0 : index
      %c0_24 = arith.constant 0 : index
      %34 = vector.load %arg8[%c0_23, %c0_24] : memref<16x128xf32, #tpu.memory_space<vmem>>, vector<16x128xf32>
      tpu.vector_store %arg8[%c0_23, %c0_24], %33 {strides = array<i32>} : memref<16x128xf32, #tpu.memory_space<vmem>>, vector<16x128xf32>,
    } else {
    }
    %c0_10 = arith.constant 0 : index
    %c0_11 = arith.constant 0 : index
    %15 = vector.load %arg8[%c0_10, %c0_11] : memref<16x128xf32, #tpu.memory_space<vmem>>, vector<16x128xf32>
    %cst = arith.constant 0.000000e+00 : f32
    %cst_12 = arith.constant 1.000000e+00 : f32
    %16 = vector.broadcast %cst : f32 to vector<16x128xf32>
    %17 = arith.maximumf %16, %15 : vector<16x128xf32>
    %18 = vector.broadcast %cst_12 : f32 to vector<16x128xf32>
    %19 = arith.minimumf %18, %17 : vector<16x128xf32>
    %c0_13 = arith.constant 0 : index
    %c0_14 = arith.constant 0 : index
    %c0_15 = arith.constant 0 : index
    %20 = vector.load %arg6[%c0_13, %c0_14, %c0_15] : memref<1x16x128xf32, #tpu.memory_space<vmem>>, vector<1x16x128xf32>
    %21 = vector.shape_cast %20 : vector<1x16x128xf32> to vector<16x128xf32>
    %22 = arith.addf %19, %21 : vector<16x128xf32>
    %c0_16 = arith.constant 0 : index
    %c0_17 = arith.constant 0 : index
    %c0_18 = arith.constant 0 : index
    %23 = vector.load %arg7[%c0_16, %c0_17, %c0_18] : memref<1x16x128xf32, #tpu.memory_space<vmem>>, vector<1x16x128xf32>
    %24 = vector.shape_cast %23 : vector<1x16x128xf32> to vector<16x128xf32>
    %25 = vector.shape_cast %22 : vector<16x128xf32> to vector<1x16x128xf32>
    tpu.vector_store %arg7[%c0_16, %c0_17, %c0_18], %25 {strides = array<i32>} : memref<1x16x128xf32, #tpu.memory_space<vmem>>, vector<1x16x128xf32>,
    return
  }
  func.func @transform_0(%arg0: i32, %arg1: i32) -> i32 {
    %c0_i32 = arith.constant 0 : i32
    %c0_i32_0 = arith.constant 0 : i32
    return %c0_i32 : i32
  }
  func.func @transform_1(%arg0: i32, %arg1: i32) -> (i32, i32, i32) {
    %c0_i32 = arith.constant 0 : i32
    %c0_i32_0 = arith.constant 0 : i32
    return %arg1, %arg0, %c0_i32 : i32, i32, i32
  }
  func.func @transform_2(%arg0: i32, %arg1: i32) -> (i32, i32) {
    %c0_i32 = arith.constant 0 : i32
    %c0_i32_0 = arith.constant 0 : i32
    %c0_i32_1 = arith.constant 0 : i32
    return %c0_i32, %c0_i32_0 : i32, i32
  }
  func.func @transform_3(%arg0: i32, %arg1: i32) -> (i32, i32) {
    %c0_i32 = arith.constant 0 : i32
    %c0_i32_0 = arith.constant 0 : i32
    %c0_i32_1 = arith.constant 0 : i32
    return %c0_i32, %c0_i32_0 : i32, i32
  }
  func.func @transform_4(%arg0: i32, %arg1: i32) -> (i32, i32, i32) {
    %c0_i32 = arith.constant 0 : i32
    %c0_i32_0 = arith.constant 0 : i32
    return %arg1, %arg0, %c0_i32 : i32, i32, i32
  }
  func.func @transform_5(%arg0: i32, %arg1: i32) -> (i32, i32, i32) {
    %c0_i32 = arith.constant 0 : i32
    %c0_i32_0 = arith.constant 0 : i32
    return %arg1, %arg0, %c0_i32 : i32, i32, i32
  }
}

</mosaic_0001>

<bundles_post_ra>
// kernel: squeeze.4
= control target key start
LH: loop header
LB: loop body
LE: loop exit
PB: predicated region body
PF: predicated region fallthrough
CT: control target
= control target key end

     0   :  { %vm3_vm0 = vcmask 31744   ;;  %s264_s8 = smov 116   ;;  %s265_s17 = smov 120   ;;  %s547_s0 = inlined_call_operand.vmem [shape: f32[8,64], index: 0, kind: input, shape index: {}]   ;;  %s548_s1 = inlined_call_operand.vmem [shape: f32[128,4], index: 1, kind: output, shape index: {}]  }
   0x1   :  { %v8_v0 = vld [vmem:[%s547_s0] sm:$0xff]   ;;  %s263_s0 = smov 124   ;;  %s266_s18 = smov 112  }
   0x2   :  { %9 = vrot.lane.b32.xlu0 %v8_v0, %s263_s0  ;;  %33 = vrot.lane.b32.xlu1 %v8_v0, %s264_s8  ;;  %4 = vst.msk [vmem:[%s548_s1] ss:$16 sm:$0x3] %vm3_vm0, %v8_v0   ;;  %5 = vst.msk [vmem:[%s548_s1] ss:$16 sm:$0xc] %vm3_vm0, %v8_v0  }
   0x3   :  { %6 = vst.msk [vmem:[%s548_s1] ss:$16 sm:$0x30] %vm3_vm0, %v8_v0   ;;  %7 = vst.msk [vmem:[%s548_s1] ss:$16 sm:$0xc0] %vm3_vm0, %v8_v0  }
   0x4   :  { %s267_s19 = smov 108   ;;  %s268_s20 = smov 104  }
   0x5   :  { %s269_s21 = smov 100   ;;  %s270_s22 = smov 96  }
   0x6   :  { %21 = vrot.lane.b32.xlu0 %v8_v0, %s265_s17  ;;  %45 = vrot.lane.b32.xlu1 %v8_v0, %s266_s18  ;;  %s271_s23 = smov 92   ;;  %s272_s24 = smov 88  }
   0x7   :  { %s273_s25 = smov 84   ;;  %s274_s26 = smov 80  }
   0x8   :  { %s275_s27 = smov 76   ;;  %s276_s28 = smov 72  }
   0x9   :  { %s277_s29 = smov 68  }
   0xa   :  { %57 = vrot.lane.b32.xlu0 %v8_v0, %s267_s19  ;;  %69 = vrot.lane.b32.xlu1 %v8_v0, %s268_s20 }
   0xe   :  { %81 = vrot.lane.b32.xlu0 %v8_v0, %s269_s21  ;;  %93 = vrot.lane.b32.xlu1 %v8_v0, %s270_s22 }
  0x12   :  { %105 = vrot.lane.b32.xlu0 %v8_v0, %s271_s23  ;;  %117 = vrot.lane.b32.xlu1 %v8_v0, %s272_s24 }
  0x16   :  { %129 = vrot.lane.b32.xlu0 %v8_v0, %s273_s25  ;;  %141 = vrot.lane.b32.xlu1 %v8_v0, %s274_s26 }
  0x1a   :  { %153 = vrot.lane.b32.xlu0 %v8_v0, %s275_s27  ;;  %165 = vrot.lane.b32.xlu1 %v8_v0, %s276_s28 }
  0x1e   :  { %177 = vrot.lane.b32.xlu0 %v8_v0, %s277_s29 }
  0x74   :  { %v10_v1 = vpop.permute.xlu0 %9   ;;  %v34_v2 = vpop.permute.xlu1 %33  }
  0x75   :  { %188 = vst.msk [vmem:[%s548_s1 + $0x1] ss:$16 sm:$0x3] %vm3_vm0, %v10_v1   ;;  %189 = vst.msk [vmem:[%s548_s1 + $0x1] ss:$16 sm:$0xc] %vm3_vm0, %v10_v1  }
  0x76   :  { %190 = vst.msk [vmem:[%s548_s1 + $0x1] ss:$16 sm:$0x30] %vm3_vm0, %v10_v1   ;;  %191 = vst.msk [vmem:[%s548_s1 + $0x1] ss:$16 sm:$0xc0] %vm3_vm0, %v10_v1  }
  0x77   :  { %196 = vst.msk [vmem:[%s548_s1 + $0x3] ss:$16 sm:$0x3] %vm3_vm0, %v34_v2   ;;  %197 = vst.msk [vmem:[%s548_s1 + $0x3] ss:$16 sm:$0xc] %vm3_vm0, %v34_v2  }
  0x78   :  { %198 = vst.msk [vmem:[%s548_s1 + $0x3] ss:$16 sm:$0x30] %vm3_vm0, %v34_v2   ;;  %199 = vst.msk [vmem:[%s548_s1 + $0x3] ss:$16 sm:$0xc0] %vm3_vm0, %v34_v2   ;;  %v22_v3 = vpop.permute.xlu0 %21   ;;  %v46_v4 = vpop.permute.xlu1 %45  }
  0x79   :  { %192 = vst.msk [vmem:[%s548_s1 + $0x2] ss:$16 sm:$0x3] %vm3_vm0, %v22_v3   ;;  %193 = vst.msk [vmem:[%s548_s1 + $0x2] ss:$16 sm:$0xc] %vm3_vm0, %v22_v3  }
  0x7a   :  { %194 = vst.msk [vmem:[%s548_s1 + $0x2] ss:$16 sm:$0x30] %vm3_vm0, %v22_v3   ;;  %195 = vst.msk [vmem:[%s548_s1 + $0x2] ss:$16 sm:$0xc0] %vm3_vm0, %v22_v3  }
  0x7b   :  { %200 = vst.msk [vmem:[%s548_s1 + $0x4] ss:$16 sm:$0x3] %vm3_vm0, %v46_v4   ;;  %201 = vst.msk [vmem:[%s548_s1 + $0x4] ss:$16 sm:$0xc] %vm3_vm0, %v46_v4  }
  0x7c   :  { %202 = vst.msk [vmem:[%s548_s1 + $0x4] ss:$16 sm:$0x30] %vm3_vm0, %v46_v4   ;;  %203 = vst.msk [vmem:[%s548_s1 + $0x4] ss:$16 sm:$0xc0] %vm3_vm0, %v46_v4   ;;  %v58_v5 = vpop.permute.xlu0 %57   ;;  %v70_v6 = vpop.permute.xlu1 %69  }
  0x7d   :  { %204 = vst.msk [vmem:[%s548_s1 + $0x5] ss:$16 sm:$0x3] %vm3_vm0, %v58_v5   ;;  %205 = vst.msk [vmem:[%s548_s1 + $0x5] ss:$16 sm:$0xc] %vm3_vm0, %v58_v5  }
  0x7e   :  { %206 = vst.msk [vmem:[%s548_s1 + $0x5] ss:$16 sm:$0x30] %vm3_vm0, %v58_v5   ;;  %207 = vst.msk [vmem:[%s548_s1 + $0x5] ss:$16 sm:$0xc0] %vm3_vm0, %v58_v5  }
  0x7f   :  { %208 = vst.msk [vmem:[%s548_s1 + $0x6] ss:$16 sm:$0x3] %vm3_vm0, %v70_v6   ;;  %209 = vst.msk [vmem:[%s548_s1 + $0x6] ss:$16 sm:$0xc] %vm3_vm0, %v70_v6  }
  0x80   :  { %210 = vst.msk [vmem:[%s548_s1 + $0x6] ss:$16 sm:$0x30] %vm3_vm0, %v70_v6   ;;  %211 = vst.msk [vmem:[%s548_s1 + $0x6] ss:$16 sm:$0xc0] %vm3_vm0, %v70_v6   ;;  %v82_v7 = vpop.permute.xlu0 %81   ;;  %v94_v8 = vpop.permute.xlu1 %93  }
  0x81   :  { %212 = vst.msk [vmem:[%s548_s1 + $0x7] ss:$16 sm:$0x3] %vm3_vm0, %v82_v7   ;;  %213 = vst.msk [vmem:[%s548_s1 + $0x7] ss:$16 sm:$0xc] %vm3_vm0, %v82_v7  }
  0x82   :  { %214 = vst.msk [vmem:[%s548_s1 + $0x7] ss:$16 sm:$0x30] %vm3_vm0, %v82_v7   ;;  %215 = vst.msk [vmem:[%s548_s1 + $0x7] ss:$16 sm:$0xc0] %vm3_vm0, %v82_v7  }
  0x83   :  { %216 = vst.msk [vmem:[%s548_s1 + $0x8] ss:$16 sm:$0x3] %vm3_vm0, %v94_v8   ;;  %217 = vst.msk [vmem:[%s548_s1 + $0x8] ss:$16 sm:$0xc] %vm3_vm0, %v94_v8  }
  0x84   :  { %218 = vst.msk [vmem:[%s548_s1 + $0x8] ss:$16 sm:$0x30] %vm3_vm0, %v94_v8   ;;  %219 = vst.msk [vmem:[%s548_s1 + $0x8] ss:$16 sm:$0xc0] %vm3_vm0, %v94_v8   ;;  %v106_v9 = vpop.permute.xlu0 %105   ;;  %v118_v10 = vpop.permute.xlu1 %117  }
  0x85   :  { %220 = vst.msk [vmem:[%s548_s1 + $0x9] ss:$16 sm:$0x3] %vm3_vm0, %v106_v9   ;;  %221 = vst.msk [vmem:[%s548_s1 + $0x9] ss:$16 sm:$0xc] %vm3_vm0, %v106_v9  }
  0x86   :  { %222 = vst.msk [vmem:[%s548_s1 + $0x9] ss:$16 sm:$0x30] %vm3_vm0, %v106_v9   ;;  %223 = vst.msk [vmem:[%s548_s1 + $0x9] ss:$16 sm:$0xc0] %vm3_vm0, %v106_v9  }
  0x87   :  { %224 = vst.msk [vmem:[%s548_s1 + $0xa] ss:$16 sm:$0x3] %vm3_vm0, %v118_v10   ;;  %225 = vst.msk [vmem:[%s548_s1 + $0xa] ss:$16 sm:$0xc] %vm3_vm0, %v118_v10  }
  0x88   :  { %226 = vst.msk [vmem:[%s548_s1 + $0xa] ss:$16 sm:$0x30] %vm3_vm0, %v118_v10   ;;  %227 = vst.msk [vmem:[%s548_s1 + $0xa] ss:$16 sm:$0xc0] %vm3_vm0, %v118_v10   ;;  %v130_v11 = vpop.permute.xlu0 %129   ;;  %v142_v12 = vpop.permute.xlu1 %141  }
  0x89   :  { %228 = vst.msk [vmem:[%s548_s1 + $0xb] ss:$16 sm:$0x3] %vm3_vm0, %v130_v11   ;;  %229 = vst.msk [vmem:[%s548_s1 + $0xb] ss:$16 sm:$0xc] %vm3_vm0, %v130_v11  }
  0x8a   :  { %230 = vst.msk [vmem:[%s548_s1 + $0xb] ss:$16 sm:$0x30] %vm3_vm0, %v130_v11   ;;  %231 = vst.msk [vmem:[%s548_s1 + $0xb] ss:$16 sm:$0xc0] %vm3_vm0, %v130_v11  }
  0x8b   :  { %232 = vst.msk [vmem:[%s548_s1 + $0xc] ss:$16 sm:$0x3] %vm3_vm0, %v142_v12   ;;  %233 = vst.msk [vmem:[%s548_s1 + $0xc] ss:$16 sm:$0xc] %vm3_vm0, %v142_v12  }
  0x8c   :  { %234 = vst.msk [vmem:[%s548_s1 + $0xc] ss:$16 sm:$0x30] %vm3_vm0, %v142_v12   ;;  %235 = vst.msk [vmem:[%s548_s1 + $0xc] ss:$16 sm:$0xc0] %vm3_vm0, %v142_v12   ;;  %v154_v13 = vpop.permute.xlu0 %153   ;;  %v166_v14 = vpop.permute.xlu1 %165  }
  0x8d   :  { %236 = vst.msk [vmem:[%s548_s1 + $0xd] ss:$16 sm:$0x3] %vm3_vm0, %v154_v13   ;;  %237 = vst.msk [vmem:[%s548_s1 + $0xd] ss:$16 sm:$0xc] %vm3_vm0, %v154_v13  }
  0x8e   :  { %238 = vst.msk [vmem:[%s548_s1 + $0xd] ss:$16 sm:$0x30] %vm3_vm0, %v154_v13   ;;  %239 = vst.msk [vmem:[%s548_s1 + $0xd] ss:$16 sm:$0xc0] %vm3_vm0, %v154_v13  }
  0x8f   :  { %240 = vst.msk [vmem:[%s548_s1 + $0xe] ss:$16 sm:$0x3] %vm3_vm0, %v166_v14   ;;  %241 = vst.msk [vmem:[%s548_s1 + $0xe] ss:$16 sm:$0xc] %vm3_vm0, %v166_v14  }
  0x90   :  { %242 = vst.msk [vmem:[%s548_s1 + $0xe] ss:$16 sm:$0x30] %vm3_vm0, %v166_v14   ;;  %243 = vst.msk [vmem:[%s548_s1 + $0xe] ss:$16 sm:$0xc0] %vm3_vm0, %v166_v14   ;;  %v178_v15 = vpop.permute.xlu0 %177  }
  0x91   :  { %244 = vst.msk [vmem:[%s548_s1 + $0xf] ss:$16 sm:$0x3] %vm3_vm0, %v178_v15   ;;  %245 = vst.msk [vmem:[%s548_s1 + $0xf] ss:$16 sm:$0xc] %vm3_vm0, %v178_v15  }
  0x92   :  { %246 = vst.msk [vmem:[%s548_s1 + $0xf] ss:$16 sm:$0x30] %vm3_vm0, %v178_v15   ;;  %247 = vst.msk [vmem:[%s548_s1 + $0xf] ss:$16 sm:$0xc0] %vm3_vm0, %v178_v15  }

// kernel: tile.28
= control target key start
LH: loop header
LB: loop body
LE: loop exit
PB: predicated region body
PF: predicated region fallthrough
CT: control target
= control target key end

     0   :  { %s28_s0 = inlined_call_operand.vmem [shape: f32[4], index: 0, kind: input, shape index: {}]   ;;  %s29_s1 = inlined_call_operand.vmem [shape: f32[16,4], index: 1, kind: output, shape index: {}]  }
   0x1   :  { %v4_v0 = vld [vmem:[%s28_s0] ss:$0 sm:$0xff] }
   0x2   :  { %5 = vst [vmem:[%s29_s1] sm:$0xff] %v4_v0  ;;  %8 = vst [vmem:[%s29_s1 + $0x8] sm:$0xff] %v4_v0 }

// kernel: tile.29
= control target key start
LH: loop header
LB: loop body
LE: loop exit
PB: predicated region body
PF: predicated region fallthrough
CT: control target
= control target key end

     0   :  { %s133_s10 = smov 60   ;;  %s134_s11 = smov 52   ;;  %vm3_vm0 = vcmask 31744   ;;  %vm9_vm1 = vcmask 523744   ;;  %vm15_vm2 = vcmask 490944   ;;  %vm21_vm3 = vcmask 458144   ;;  %s209_s0 = inlined_call_operand.vmem [shape: f32[16,4], index: 0, kind: input, shape index: {}]   ;;  %s210_s1 = inlined_call_operand.vmem [shape: f32[1,64], index: 1, kind: output, shape index: {}]  }
   0x1   :  { %v103_v0 = vld [vmem:[%s209_s0 + $0xf] sm:$0x1]   ;;  %v105_v1 = vld [vmem:[%s209_s0 + $0xd] sm:$0x1]   ;;  %v104_v2 = vld [vmem:[%s209_s0 + $0xe] sm:$0x1]  }
   0x2   :  { %7 = vrot.lane.b32.xlu0 %v103_v0, %s133_s10  ;;  %19 = vrot.lane.b32.xlu1 %v105_v1, %s134_s11  ;;  %v106_v3 = vld [vmem:[%s209_s0 + $0xc] sm:$0x1]   ;;  %s135_s16 = smov 56   ;;  %s136_s17 = smov 48   ;;  %v107_v4 = vld [vmem:[%s209_s0 + $0xb] sm:$0x1]  }
   0x3   :  { %v108_v5 = vld [vmem:[%s209_s0 + $0xa] sm:$0x1]   ;;  %v2_v6 = vld [vmem:[%s209_s0] sm:$0x1]   ;;  %s137_s24 = smov 44   ;;  %s138_s25 = smov 40  }
   0x4   :  { %4 = vst.msk [vmem:[#allocation0] sm:$0x1] %vm3_vm0, %v2_v6   ;;  %v109_v7 = vld [vmem:[%s209_s0 + $0x9] sm:$0x1]   ;;  %v110_v8 = vld [vmem:[%s209_s0 + $0x8] sm:$0x1]  }
   0x5   :  { %s139_s30 = smov 36   ;;  %s140_s2 = smov 32   ;;  %v111_v9 = vld [vmem:[%s209_s0 + $0x7] sm:$0x1]   ;;  %v112_v10 = vld [vmem:[%s209_s0 + $0x6] sm:$0x1]  }
   0x6   :  { %13 = vrot.lane.b32.xlu0 %v104_v2, %s135_s16  ;;  %25 = vrot.lane.b32.xlu1 %v106_v3, %s136_s17  ;;  %s141_s7 = smov 28   ;;  %s142_s8 = smov 24   ;;  %v113_v11 = vld [vmem:[%s209_s0 + $0x5] sm:$0x1]   ;;  %v114_v12 = vld [vmem:[%s209_s0 + $0x4] sm:$0x1]  }
   0x7   :  { %s143_s13 = smov 20   ;;  %s144_s14 = smov 16   ;;  %v115_v13 = vld [vmem:[%s209_s0 + $0x3] sm:$0x1]   ;;  %v116_v14 = vld [vmem:[%s209_s0 + $0x2] sm:$0x1]  }
   0x8   :  { %s145_s19 = smov 12   ;;  %s146_s20 = smov 8   ;;  %v117_v15 = vld [vmem:[%s209_s0 + $0x1] sm:$0x1]   ;;  %vm27_vm4 = vcmask 425344   ;;  %vm33_vm5 = vcmask 392544  }
   0x9   :  { %s147_s0 = smov 4   ;;  %vm39_vm6 = vcmask 359744   ;;  %vm45_vm7 = vcmask 326944   ;;  %vm51_vm8 = vcmask 294144   ;;  %vm57_vm9 = vcmask 261344  }
   0xa   :  { %31 = vrot.lane.b32.xlu0 %v107_v4, %s137_s24  ;;  %37 = vrot.lane.b32.xlu1 %v108_v5, %s138_s25  ;;  %vm63_vm10 = vcmask 228544   ;;  %vm69_vm11 = vcmask 195744   ;;  %vm75_vm12 = vcmask 162944   ;;  %vm81_vm13 = vcmask 130144  }
   0xb   :  { %vm87_vm14 = vcmask 97344   ;;  %vm93_vm15 = vcmask 64544  }
   0xe   :  { %43 = vrot.lane.b32.xlu0 %v109_v7, %s139_s30  ;;  %49 = vrot.lane.b32.xlu1 %v110_v8, %s140_s2 }
  0x12   :  { %55 = vrot.lane.b32.xlu0 %v111_v9, %s141_s7  ;;  %61 = vrot.lane.b32.xlu1 %v112_v10, %s142_s8 }
  0x16   :  { %67 = vrot.lane.b32.xlu0 %v113_v11, %s143_s13  ;;  %73 = vrot.lane.b32.xlu1 %v114_v12, %s144_s14 }
  0x1a   :  { %79 = vrot.lane.b32.xlu0 %v115_v13, %s145_s19  ;;  %85 = vrot.lane.b32.xlu1 %v116_v14, %s146_s20 }
  0x1e   :  { %91 = vrot.lane.b32.xlu0 %v117_v15, %s147_s0 }
  0x74   :  { %v8_v16 = vpop.permute.xlu0 %7   ;;  %v20_v17 = vpop.permute.xlu1 %19  }
  0x75   :  { %10 = vst.msk [vmem:[#allocation0] sm:$0x1] %vm9_vm1, %v8_v16  }
  0x78   :  { %v14_v18 = vpop.permute.xlu0 %13   ;;  %v26_v19 = vpop.permute.xlu1 %25  }
  0x79   :  { %16 = vst.msk [vmem:[#allocation0] sm:$0x1] %vm15_vm2, %v14_v18  }
  0x7a   :  { %22 = vst.msk [vmem:[#allocation0] sm:$0x1] %vm21_vm3, %v20_v17  }
  0x7b   :  { %28 = vst.msk [vmem:[#allocation0] sm:$0x1] %vm27_vm4, %v26_v19  }
  0x7c   :  { %v32_v20 = vpop.permute.xlu0 %31   ;;  %v38_v21 = vpop.permute.xlu1 %37  }
  0x7d   :  { %34 = vst.msk [vmem:[#allocation0] sm:$0x1] %vm33_vm5, %v32_v20  }
  0x7e   :  { %40 = vst.msk [vmem:[#allocation0] sm:$0x1] %vm39_vm6, %v38_v21  }
  0x80   :  { %v44_v22 = vpop.permute.xlu0 %43   ;;  %v50_v23 = vpop.permute.xlu1 %49  }
  0x81   :  { %46 = vst.msk [vmem:[#allocation0] sm:$0x1] %vm45_vm7, %v44_v22  }
  0x82   :  { %52 = vst.msk [vmem:[#allocation0] sm:$0x1] %vm51_vm8, %v50_v23  }
  0x84   :  { %v56_v24 = vpop.permute.xlu0 %55   ;;  %v62_v25 = vpop.permute.xlu1 %61  }
  0x85   :  { %58 = vst.msk [vmem:[#allocation0] sm:$0x1] %vm57_vm9, %v56_v24  }
  0x86   :  { %64 = vst.msk [vmem:[#allocation0] sm:$0x1] %vm63_vm10, %v62_v25  }
  0x88   :  { %v68_v26 = vpop.permute.xlu0 %67   ;;  %v74_v27 = vpop.permute.xlu1 %73  }
  0x89   :  { %70 = vst.msk [vmem:[#allocation0] sm:$0x1] %vm69_vm11, %v68_v26  }
  0x8a   :  { %76 = vst.msk [vmem:[#allocation0] sm:$0x1] %vm75_vm12, %v74_v27  }
  0x8c   :  { %v80_v28 = vpop.permute.xlu0 %79   ;;  %v86_v29 = vpop.permute.xlu1 %85  }
  0x8d   :  { %82 = vst.msk [vmem:[#allocation0] sm:$0x1] %vm81_vm13, %v80_v28  }
  0x8e   :  { %88 = vst.msk [vmem:[#allocation0] sm:$0x1] %vm87_vm14, %v86_v29  }
  0x90   :  { %v92_v30 = vpop.permute.xlu0 %91  }
  0x91   :  { %94 = vst.msk [vmem:[#allocation0] sm:$0x1] %vm93_vm15, %v92_v30  }
  0x98   :  { %v99_v31 = vld [vmem:[#allocation0] sm:$0x1] }
  0x99   :  { %102 = vst [vmem:[%s210_s1] sm:$0x1] %v99_v31 }

// kernel: tile.38
= control target key start
LH: loop header
LB: loop body
LE: loop exit
PB: predicated region body
PF: predicated region fallthrough
CT: control target
= control target key end

     0   :  { %s40_s0 = inlined_call_operand.vmem [shape: f32[4], index: 0, kind: input, shape index: {}]   ;;  %s41_s1 = inlined_call_operand.vmem [shape: f32[32,4], index: 1, kind: output, shape index: {}]  }
   0x1   :  { %v4_v0 = vld [vmem:[%s40_s0] ss:$0 sm:$0xff] }
   0x2   :  { %5 = vst [vmem:[%s41_s1] sm:$0xff] %v4_v0  ;;  %12 = vst [vmem:[%s41_s1 + $0x8] sm:$0xff] %v4_v0 }
   0x3   :  { %13 = vst [vmem:[%s41_s1 + $0x10] sm:$0xff] %v4_v0  ;;  %14 = vst [vmem:[%s41_s1 + $0x18] sm:$0xff] %v4_v0 }

// kernel: tile.39
= control target key start
LH: loop header
LB: loop body
LE: loop exit
PB: predicated region body
PF: predicated region fallthrough
CT: control target
= control target key end

     0   :  { %s261_s10 = smov 124   ;;  %s262_s11 = smov 116   ;;  %vm3_vm0 = vcmask 31744   ;;  %vm9_vm1 = vcmask 1048544   ;;  %vm15_vm2 = vcmask 1015744   ;;  %vm21_vm3 = vcmask 982944   ;;  %s401_s0 = inlined_call_operand.vmem [shape: f32[32,4], index: 0, kind: input, shape index: {}]   ;;  %s402_s1 = inlined_call_operand.vmem [shape: f32[1,128], index: 1, kind: output, shape index: {}]  }
   0x1   :  { %v199_v0 = vld [vmem:[%s401_s0 + $0x1f] sm:$0x1]   ;;  %v201_v1 = vld [vmem:[%s401_s0 + $0x1d] sm:$0x1]   ;;  %v200_v2 = vld [vmem:[%s401_s0 + $0x1e] sm:$0x1]  }
   0x2   :  { %7 = vrot.lane.b32.xlu0 %v199_v0, %s261_s10  ;;  %19 = vrot.lane.b32.xlu1 %v201_v1, %s262_s11  ;;  %v202_v3 = vld [vmem:[%s401_s0 + $0x1c] sm:$0x1]   ;;  %s263_s16 = smov 120   ;;  %s264_s17 = smov 112   ;;  %v203_v4 = vld [vmem:[%s401_s0 + $0x1b] sm:$0x1]  }
   0x3   :  { %v204_v5 = vld [vmem:[%s401_s0 + $0x1a] sm:$0x1]   ;;  %s265_s22 = smov 108   ;;  %s266_s23 = smov 104   ;;  %v205_v6 = vld [vmem:[%s401_s0 + $0x19] sm:$0x1]  }
   0x4   :  { %v206_v7 = vld [vmem:[%s401_s0 + $0x18] sm:$0x1]   ;;  %s267_s28 = smov 100   ;;  %s268_s29 = smov 96   ;;  %v207_v8 = vld [vmem:[%s401_s0 + $0x17] sm:$0x1]  }
   0x5   :  { %v208_v9 = vld [vmem:[%s401_s0 + $0x16] sm:$0x1]   ;;  %v2_v10 = vld [vmem:[%s401_s0] sm:$0x1]   ;;  %s269_s7 = smov 92   ;;  %s270_s8 = smov 88  }
   0x6   :  { %13 = vrot.lane.b32.xlu0 %v200_v2, %s263_s16  ;;  %25 = vrot.lane.b32.xlu1 %v202_v3, %s264_s17  ;;  %4 = vst.msk [vmem:[#allocation0] sm:$0x1] %vm3_vm0, %v2_v10   ;;  %v209_v11 = vld [vmem:[%s401_s0 + $0x15] sm:$0x1]   ;;  %v210_v12 = vld [vmem:[%s401_s0 + $0x14] sm:$0x1]  }
   0x7   :  { %s271_s13 = smov 84   ;;  %s272_s14 = smov 80   ;;  %v211_v13 = vld [vmem:[%s401_s0 + $0x13] sm:$0x1]   ;;  %v212_v14 = vld [vmem:[%s401_s0 + $0x12] sm:$0x1]  }
   0x8   :  { %s273_s19 = smov 76   ;;  %s274_s20 = smov 72   ;;  %v213_v15 = vld [vmem:[%s401_s0 + $0x11] sm:$0x1]   ;;  %v214_v16 = vld [vmem:[%s401_s0 + $0x10] sm:$0x1]  }
   0x9   :  { %s275_s25 = smov 68   ;;  %s276_s26 = smov 64   ;;  %v215_v17 = vld [vmem:[%s401_s0 + $0xf] sm:$0x1]   ;;  %v216_v18 = vld [vmem:[%s401_s0 + $0xe] sm:$0x1]  }
   0xa   :  { %31 = vrot.lane.b32.xlu0 %v203_v4, %s265_s22  ;;  %37 = vrot.lane.b32.xlu1 %v204_v5, %s266_s23  ;;  %s277_s2 = smov 60   ;;  %s278_s3 = smov 56   ;;  %v217_v19 = vld [vmem:[%s401_s0 + $0xd] sm:$0x1]   ;;  %v218_v20 = vld [vmem:[%s401_s0 + $0xc] sm:$0x1]  }
   0xb   :  { %s280_s9 = smov 48   ;;  %v219_v21 = vld [vmem:[%s401_s0 + $0xb] sm:$0x1]   ;;  %v220_v22 = vld [vmem:[%s401_s0 + $0xa] sm:$0x1]   ;;  %s282_s15 = smov 40  }
   0xc   :  { %v221_v23 = vld [vmem:[%s401_s0 + $0x9] sm:$0x1]   ;;  %v222_v24 = vld [vmem:[%s401_s0 + $0x8] sm:$0x1]   ;;  %s284_s21 = smov 32   ;;  %s286_s27 = smov 24  }
   0xd   :  { %v223_v25 = vld [vmem:[%s401_s0 + $0x7] sm:$0x1]   ;;  %v224_v26 = vld [vmem:[%s401_s0 + $0x6] sm:$0x1]   ;;  %v225_v27 = vld [vmem:[%s401_s0 + $0x5] sm:$0x1]  }
   0xe   :  { %43 = vrot.lane.b32.xlu0 %v205_v6, %s267_s28  ;;  %49 = vrot.lane.b32.xlu1 %v206_v7, %s268_s29  ;;  %v226_v28 = vld [vmem:[%s401_s0 + $0x4] sm:$0x1]   ;;  %s288_s4 = smov 16   ;;  %v227_v29 = vld [vmem:[%s401_s0 + $0x3] sm:$0x1]   ;;  %s290_s10 = smov 8  }
   0xf   :  { %v228_v30 = vld [vmem:[%s401_s0 + $0x2] sm:$0x1]   ;;  %v229_v31 = vld [vmem:[%s401_s0 + $0x1] sm:$0x1]   ;;  %s291_s0 = smov 4   ;;  %vm27_vm4 = vcmask 950144  }
  0x10   :  { %vm33_vm5 = vcmask 917344   ;;  %vm39_vm6 = vcmask 884544   ;;  %vm45_vm7 = vcmask 851744   ;;  %vm51_vm8 = vcmask 818944  }
  0x11   :  { %vm57_vm9 = vcmask 786144   ;;  %vm63_vm10 = vcmask 753344   ;;  %vm69_vm11 = vcmask 720544   ;;  %vm75_vm12 = vcmask 687744  }
  0x12   :  { %55 = vrot.lane.b32.xlu0 %v207_v8, %s269_s7  ;;  %61 = vrot.lane.b32.xlu1 %v208_v9, %s270_s8  ;;  %s279_s8 = smov 52   ;;  %vm81_vm13 = vcmask 654944   ;;  %vm87_vm14 = vcmask 622144   ;;  %vm93_vm15 = vcmask 589344   ;;  %vm99_vm0 = vcmask 556544  }
  0x16   :  { %67 = vrot.lane.b32.xlu0 %v209_v11, %s271_s13  ;;  %73 = vrot.lane.b32.xlu1 %v210_v12, %s272_s14  ;;  %s281_s14 = smov 44  }
  0x1a   :  { %79 = vrot.lane.b32.xlu0 %v211_v13, %s273_s19  ;;  %85 = vrot.lane.b32.xlu1 %v212_v14, %s274_s20  ;;  %s283_s20 = smov 36  }
  0x1e   :  { %91 = vrot.lane.b32.xlu0 %v213_v15, %s275_s25  ;;  %97 = vrot.lane.b32.xlu1 %v214_v16, %s276_s26  ;;  %s285_s26 = smov 28  }
  0x22   :  { %103 = vrot.lane.b32.xlu0 %v215_v17, %s277_s2  ;;  %109 = vrot.lane.b32.xlu1 %v216_v18, %s278_s3  ;;  %s287_s3 = smov 20  }
  0x26   :  { %115 = vrot.lane.b32.xlu0 %v217_v19, %s279_s8  ;;  %121 = vrot.lane.b32.xlu1 %v218_v20, %s280_s9  ;;  %s289_s9 = smov 12  }
  0x2a   :  { %127 = vrot.lane.b32.xlu0 %v219_v21, %s281_s14  ;;  %133 = vrot.lane.b32.xlu1 %v220_v22, %s282_s15 }
  0x2e   :  { %139 = vrot.lane.b32.xlu0 %v221_v23, %s283_s20  ;;  %145 = vrot.lane.b32.xlu1 %v222_v24, %s284_s21 }
  0x32   :  { %151 = vrot.lane.b32.xlu0 %v223_v25, %s285_s26  ;;  %157 = vrot.lane.b32.xlu1 %v224_v26, %s286_s27 }
  0x36   :  { %163 = vrot.lane.b32.xlu0 %v225_v27, %s287_s3  ;;  %169 = vrot.lane.b32.xlu1 %v226_v28, %s288_s4 }
  0x3a   :  { %175 = vrot.lane.b32.xlu0 %v227_v29, %s289_s9  ;;  %181 = vrot.lane.b32.xlu1 %v228_v30, %s290_s10 }
  0x3e   :  { %187 = vrot.lane.b32.xlu0 %v229_v31, %s291_s0 }
  0x74   :  { %v8_v32 = vpop.permute.xlu0 %7   ;;  %v20_v33 = vpop.permute.xlu1 %19  }
  0x75   :  { %10 = vst.msk [vmem:[#allocation0] sm:$0x1] %vm9_vm1, %v8_v32   ;;  %vm105_vm1 = vcmask 523744  }
  0x78   :  { %v14_v34 = vpop.permute.xlu0 %13   ;;  %v26_v35 = vpop.permute.xlu1 %25  }
  0x79   :  { %16 = vst.msk [vmem:[#allocation0] sm:$0x1] %vm15_vm2, %v14_v34   ;;  %vm111_vm2 = vcmask 490944  }
  0x7a   :  { %22 = vst.msk [vmem:[#allocation0] sm:$0x1] %vm21_vm3, %v20_v33   ;;  %vm117_vm3 = vcmask 458144  }
  0x7b   :  { %28 = vst.msk [vmem:[#allocation0] sm:$0x1] %vm27_vm4, %v26_v35   ;;  %vm123_vm4 = vcmask 425344  }
  0x7c   :  { %v32_v36 = vpop.permute.xlu0 %31   ;;  %v38_v37 = vpop.permute.xlu1 %37  }
  0x7d   :  { %34 = vst.msk [vmem:[#allocation0] sm:$0x1] %vm33_vm5, %v32_v36   ;;  %vm129_vm5 = vcmask 392544  }
  0x7e   :  { %40 = vst.msk [vmem:[#allocation0] sm:$0x1] %vm39_vm6, %v38_v37   ;;  %vm135_vm6 = vcmask 359744  }
  0x80   :  { %v44_v38 = vpop.permute.xlu0 %43   ;;  %v50_v39 = vpop.permute.xlu1 %49  }
  0x81   :  { %46 = vst.msk [vmem:[#allocation0] sm:$0x1] %vm45_vm7, %v44_v38   ;;  %vm141_vm7 = vcmask 326944  }
  0x82   :  { %52 = vst.msk [vmem:[#allocation0] sm:$0x1] %vm51_vm8, %v50_v39   ;;  %vm147_vm8 = vcmask 294144  }
  0x84   :  { %v56_v40 = vpop.permute.xlu0 %55   ;;  %v62_v41 = vpop.permute.xlu1 %61  }
  0x85   :  { %58 = vst.msk [vmem:[#allocation0] sm:$0x1] %vm57_vm9, %v56_v40   ;;  %vm153_vm9 = vcmask 261344  }
  0x86   :  { %64 = vst.msk [vmem:[#allocation0] sm:$0x1] %vm63_vm10, %v62_v41   ;;  %vm159_vm10 = vcmask 228544  }
  0x88   :  { %v68_v42 = vpop.permute.xlu0 %67   ;;  %v74_v43 = vpop.permute.xlu1 %73  }
  0x89   :  { %70 = vst.msk [vmem:[#allocation0] sm:$0x1] %vm69_vm11, %v68_v42   ;;  %vm165_vm11 = vcmask 195744  }
  0x8a   :  { %76 = vst.msk [vmem:[#allocation0] sm:$0x1] %vm75_vm12, %v74_v43   ;;  %vm171_vm12 = vcmask 162944  }
  0x8c   :  { %v80_v44 = vpop.permute.xlu0 %79   ;;  %v86_v45 = vpop.permute.xlu1 %85  }
  0x8d   :  { %82 = vst.msk [vmem:[#allocation0] sm:$0x1] %vm81_vm13, %v80_v44   ;;  %vm177_vm13 = vcmask 130144  }
  0x8e   :  { %88 = vst.msk [vmem:[#allocation0] sm:$0x1] %vm87_vm14, %v86_v45   ;;  %vm183_vm14 = vcmask 97344  }
  0x90   :  { %v92_v46 = vpop.permute.xlu0 %91   ;;  %v98_v47 = vpop.permute.xlu1 %97  }
  0x91   :  { %94 = vst.msk [vmem:[#allocation0] sm:$0x1] %vm93_vm15, %v92_v46   ;;  %vm189_vm15 = vcmask 64544  }
  0x92   :  { %100 = vst.msk [vmem:[#allocation0] sm:$0x1] %vm99_vm0, %v98_v47  }
  0x94   :  { %v104_v48 = vpop.permute.xlu0 %103   ;;  %v110_v49 = vpop.permute.xlu1 %109  }
  0x95   :  { %106 = vst.msk [vmem:[#allocation0] sm:$0x1] %vm105_vm1, %v104_v48  }
  0x96   :  { %112 = vst.msk [vmem:[#allocation0] sm:$0x1] %vm111_vm2, %v110_v49  }
  0x98   :  { %v116_v50 = vpop.permute.xlu0 %115   ;;  %v122_v51 = vpop.permute.xlu1 %121  }
  0x99   :  { %118 = vst.msk [vmem:[#allocation0] sm:$0x1] %vm117_vm3, %v116_v50  }
  0x9a   :  { %124 = vst.msk [vmem:[#allocation0] sm:$0x1] %vm123_vm4, %v122_v51  }
  0x9c   :  { %v128_v52 = vpop.permute.xlu0 %127   ;;  %v134_v53 = vpop.permute.xlu1 %133  }
  0x9d   :  { %130 = vst.msk [vmem:[#allocation0] sm:$0x1] %vm129_vm5, %v128_v52  }
  0x9e   :  { %136 = vst.msk [vmem:[#allocation0] sm:$0x1] %vm135_vm6, %v134_v53  }
  0xa0   :  { %v140_v54 = vpop.permute.xlu0 %139   ;;  %v146_v55 = vpop.permute.xlu1 %145  }
  0xa1   :  { %142 = vst.msk [vmem:[#allocation0] sm:$0x1] %vm141_vm7, %v140_v54  }
  0xa2   :  { %148 = vst.msk [vmem:[#allocation0] sm:$0x1] %vm147_vm8, %v146_v55  }
  0xa4   :  { %v152_v56 = vpop.permute.xlu0 %151   ;;  %v158_v57 = vpop.permute.xlu1 %157  }
  0xa5   :  { %154 = vst.msk [vmem:[#allocation0] sm:$0x1] %vm153_vm9, %v152_v56  }
  0xa6   :  { %160 = vst.msk [vmem:[#allocation0] sm:$0x1] %vm159_vm10, %v158_v57  }
  0xa8   :  { %v164_v58 = vpop.permute.xlu0 %163   ;;  %v170_v59 = vpop.permute.xlu1 %169  }
  0xa9   :  { %166 = vst.msk [vmem:[#allocation0] sm:$0x1] %vm165_vm11, %v164_v58  }
  0xaa   :  { %172 = vst.msk [vmem:[#allocation0] sm:$0x1] %vm171_vm12, %v170_v59  }
  0xac   :  { %v176_v60 = vpop.permute.xlu0 %175   ;;  %v182_v61 = vpop.permute.xlu1 %181  }
  0xad   :  { %178 = vst.msk [vmem:[#allocation0] sm:$0x1] %vm177_vm13, %v176_v60  }
  0xae   :  { %184 = vst.msk [vmem:[#allocation0] sm:$0x1] %vm183_vm14, %v182_v61  }
  0xb0   :  { %v188_v62 = vpop.permute.xlu0 %187  }
  0xb1   :  { %190 = vst.msk [vmem:[#allocation0] sm:$0x1] %vm189_vm15, %v188_v62  }
  0xb8   :  { %v195_v63 = vld [vmem:[#allocation0] sm:$0x1] }
  0xb9   :  { %198 = vst [vmem:[%s402_s1] sm:$0x1] %v195_v63 }

// kernel: liaf_resblock_lif_forward.3
= control target key start
LH: loop header
LB: loop body
LE: loop exit
PB: predicated region body
PF: predicated region fallthrough
CT: control target
= control target key end

     0   :  { %s934_s17 = smov 0   ;;  %s936_s18 = smov 0   ;;  %s1048_s0 = inlined_call_operand.<no memory space> [shape: f32[1], index: 0, kind: input, shape index: {}]   ;;  %s1049_s1 = inlined_call_operand.vmem [shape: f32[8,32,64], index: 1, kind: input, shape index: {}]   ;;  %s1050_s2 = inlined_call_operand.vmem [shape: bf16[64,384], index: 2, kind: input, shape index: {}]   ;;  %s1051_s3 = inlined_call_operand.vmem [shape: f32[8,32,64], index: 3, kind: output, shape index: {0}]   ;;  %s1052_s4 = inlined_call_operand.vmem [shape: f32[8,2,64], index: 4, kind: output, shape index: {1}]  }
   0x1   :  { %10 = sst [smem:[#allocation3]] %s1048_s0  ;;  %s938_s19 = smov 0  }
   0x2 LB: > { %s25_s0 = sadd.s32 1, %s898_s18  ;;  %p788_p0 = scmp.ge.s32.totalorder %s902_s19, 1  ;;  %s902_s19 = sphi %s938_s19, %s16_s19   ;;  %s898_s18 = sphi %s936_s18, %s1054_s18   ;;  %s894_s17 = sphi %s934_s17, %s1053_s17  }
   0x3   : > { %p26_p1 = scmp.ge.s32.totalorder %s25_s0, 8  ;;  %p191_p2 = scmp.lt.s32.totalorder %s902_s19, 9 }
   0x5   : > { %s1056_s0 = smov (%p26_p1, %s25_s0), 0  ;;  %p192_p3 = pnand %p788_p0, %p191_p2 }
   0x6   : > { %p232_p4 = scmp.lt.s32.totalorder (!%p192_p3), %s894_s17, 7  ;;  %s264_s20 = sld [smem:[#allocation3]] (!%p192_p3) }
   0x7   : > { %195 = sbr.rel (%p192_p3) target bundleno = 313 (0x139), region = 32  ;;  %p794_p5 = scmp.ne.s32.totalorder (!%p192_p3), %s894_s17, 0 }
   0xc   : > { %s233_s21 = scalar_select %p232_p4, %s894_s17, 7 }
   0xd   : > { %268 = sbr.rel (%p794_p5) target bundleno = 21 (0x15), region = 36 }
   0xe   : > { %s818_s22 = sshll.u32 %s233_s21, 5  ;;  %s793_s23 = sshll.u32 %s233_s21, 1 }
   0xf   : > { %s239_s26 = scalar_lea.vmem %s1049_s1, %s818_s22  ;;  %s962_s29 = scalar_lea.vmem %s1051_s3, %s818_s22 }
  0x10   : > { %s967_s6 = scalar_lea.vmem %s1052_s4, %s793_s23  ;;  %v260_v0 = vld [vmem:[%s239_s26] sm:$0xff]  ;;  %v261_v1 = vld [vmem:[%s239_s26 + $0x8] sm:$0xff]  ;;  %v262_v2 = vld [vmem:[%s239_s26 + $0x10] sm:$0xff] }
  0x11   : > { %v263_v3 = vld [vmem:[%s239_s26 + $0x18] sm:$0xff] }
  0x12   : > { %vm269_vm0 = vcmask 523264  }
  0x13   : > { %270 = vst.msk [vmem:[#allocation2] sm:$0xff] %vm269_vm0, %v260_v0  ;;  %271 = vst.msk [vmem:[#allocation2 + $0x8] sm:$0xff] %vm269_vm0, %v261_v1 }
  0x14   : > { %272 = vst.msk [vmem:[#allocation2 + $0x10] sm:$0xff] %vm269_vm0, %v262_v2  ;;  %273 = vst.msk [vmem:[#allocation2 + $0x18] sm:$0xff] %vm269_vm0, %v263_v3 }
  0x15 PF: > { %p795_p6 = scmp.le.s32.totalorder %s894_s17, 0 }
  0x17   : > { %277 = sbr.rel (%p795_p6) target bundleno = 37 (0x25), region = 40 }
  0x1c   : > { %v278_v4 = vld [vmem:[#allocation2] sm:$0xff]  ;;  %v286_v5 = vstv %s264_s20  ;;  %v279_v6 = vld [vmem:[#allocation2 + $0x8] sm:$0xff]  ;;  %v280_v7 = vld [vmem:[#allocation2 + $0x10] sm:$0xff]  ;;  %vm299_vm5 = vcmask 523264  }
  0x1d   : > { %vm282_vm1 = vcmp.gt.f32.partialorder %v278_v4, 0.5  ;;  %vm283_vm2 = vcmp.gt.f32.partialorder %v279_v6, 0.5  ;;  %vm284_vm3 = vcmp.gt.f32.partialorder %v280_v7, 0.5  ;;  %v281_v8 = vld [vmem:[#allocation2 + $0x18] sm:$0xff] }
  0x1e   : > { %v287_v9 = vsel %vm282_vm1, 0.0, %v286_v5  ;;  %v288_v10 = vsel %vm283_vm2, 0.0, %v286_v5  ;;  %v289_v11 = vsel %vm284_vm3, 0.0, %v286_v5  ;;  %vm285_vm4 = vcmp.gt.f32.partialorder %v281_v8, 0.5 }
  0x1f   : > { %v291_v12 = vmul.f32 %v287_v9, %v278_v4  ;;  %v292_v13 = vmul.f32 %v288_v10, %v279_v6  ;;  %v293_v14 = vmul.f32 %v289_v11, %v280_v7  ;;  %v290_v15 = vsel %vm285_vm4, 0.0, %v286_v5 }
  0x20   : > { %v294_v16 = vmul.f32 %v290_v15, %v281_v8 }
  0x21   : > { %v295_v17 = vadd.f32 %v291_v12, %v260_v0  ;;  %v296_v18 = vadd.f32 %v292_v13, %v261_v1  ;;  %v297_v19 = vadd.f32 %v293_v14, %v262_v2 }
  0x22   : > { %v298_v20 = vadd.f32 %v294_v16, %v263_v3 }
  0x23   : > { %300 = vst.msk [vmem:[#allocation2] sm:$0xff] %vm299_vm5, %v295_v17  ;;  %301 = vst.msk [vmem:[#allocation2 + $0x8] sm:$0xff] %vm299_vm5, %v296_v18 }
  0x24   : > { %302 = vst.msk [vmem:[#allocation2 + $0x10] sm:$0xff] %vm299_vm5, %v297_v19  ;;  %303 = vst.msk [vmem:[#allocation2 + $0x18] sm:$0xff] %vm299_vm5, %v298_v20 }
  0x25 PF: > { %v864_v21 = vld [vmem:[%s1050_s2 + $0x4c] ss:$12 sps:$4 sm:$0xff]   ;;  %v866_v22 = vld [vmem:[%s1050_s2 + $0x50] ss:$12 sps:$4 sm:$0xff]   ;;  %v904_v23 = vmov 0   ;;  %vm398_vm6 = vcmask 523264   ;;  %v507_v48 = vlaneseq }
  0x26   : > { %437 = vmatprep.mubr.bf16.mxu0 %v904_v23  ;;  %413 = vmatprep.subr.bf16.mxu0 %v864_v21  ;;  %v867_v24 = vld [vmem:[%s1050_s2 + $0x48] ss:$12 sps:$4 sm:$0xff]   ;;  %v870_v26 = vld [vmem:[%s1050_s2 + $0x38] ss:$12 sps:$4 sm:$0xff]   ;;  %v871_v27 = vld [vmem:[%s1050_s2 + $0x30] ss:$12 sps:$4 sm:$0xff]  }
  0x27   : > { %826 = vmatprep.subr.bf16.mxu1 %v866_v22  ;;  %v868_v25 = vld [vmem:[%s1050_s2 + $0x34] ss:$12 sps:$4 sm:$0xff]   ;;  %414 = vmatpush1.bf16.msra.mxu0 %v867_v24  ;;  %v872_v28 = vld [vmem:[%s1050_s2 + $0x1c] ss:$12 sps:$4 sm:$0xff]   ;;  %v875_v30 = vld [vmem:[%s1050_s2 + $0x18] ss:$12 sps:$4 sm:$0xff]  }
  0x28   : > { %827 = vmatpush3.bf16.msra.mxu1 %v866_v22  ;;  %415 = vmatprep.subr.bf16.mxu0 %v868_v25  ;;  %v874_v29 = vld [vmem:[%s1050_s2 + $0x20] ss:$12 sps:$4 sm:$0xff]   ;;  %v876_v31 = vld [vmem:[%s1050_s2 + $0x4] ss:$12 sps:$4 sm:$0xff]   ;;  %v878_v32 = vld [vmem:[%s1050_s2 + $0x8] ss:$12 sps:$4 sm:$0xff]  }
  0x29   : > { %828 = vmatprep.subr.bf16.mxu1 %v870_v26  ;;  %v879_v41 = vld [vmem:[%s1050_s2] ss:$12 sps:$4 sm:$0xff]   ;;  %v508_v49 = vshrl.u32 %v507_v48, 7  ;;  %v905_v5 = vmov 0.0   ;;  %vm640_vm13 = vcmask 516096  }
  0x2a   : > { %v304_v33 = vld [vmem:[#allocation2] sm:$0xff]  ;;  %v305_v34 = vld [vmem:[#allocation2 + $0x8] sm:$0xff] }
  0x2b   : > { %416 = vmatpush1.bf16.msra.mxu0 %v871_v27  ;;  %v308_v35 = vmax.f32 %v304_v33, 0.0  ;;  %v309_v36 = vmax.f32 %v305_v34, 0.0  ;;  %v306_v37 = vld [vmem:[#allocation2 + $0x10] sm:$0xff]  ;;  %v307_v38 = vld [vmem:[#allocation2 + $0x18] sm:$0xff]  ;;  %v509_v50 = vadd.s32 8, %v508_v49  ;;  %v510_v51 = vadd.s32 16, %v508_v49 }
  0x2c   : > { %829 = vmatpush3.bf16.msra.mxu1 %v870_v26  ;;  %417 = vmatprep.subr.bf16.mxu0 %v872_v28  ;;  %v310_v39 = vmax.f32 %v306_v37, 0.0  ;;  %v311_v40 = vmax.f32 %v307_v38, 0.0  ;;  %v511_v58 = vadd.s32 24, %v508_v49  ;;  %vm588_vm7 = vcmp.lt.s32.totalorder %v508_v49, 1 }
  0x2d   : > { %830 = vmatprep.subr.bf16.mxu1 %v874_v29  ;;  %v312_v42 = vmin.f32 %v308_v35, 1.0  ;;  %v313_v43 = vmin.f32 %v309_v36, 1.0  ;;  %v523_v54 = vand.u32 15, %v509_v50  ;;  %v530_v55 = vand.u32 15, %v510_v51 }
  0x2e   : > { %v314_v44 = vmin.f32 %v310_v39, 1.0  ;;  %v315_v45 = vmin.f32 %v311_v40, 1.0  ;;  %vm605_vm10 = vcmp.lt.s32.totalorder %v508_v49, 7  ;;  %v516_v2 = vand.u32 15, %v508_v49 }
  0x2f   : > { %418 = vmatpush1.bf16.msra.mxu0 %v875_v30  ;;  %v316_v46 = vpack.c.bf16 %v313_v43, %v312_v42  ;;  %vm573_vm8 = vcmp.lt.s32.totalorder %v523_v54, 15  ;;  %vm562_vm9 = vcmp.gt.s32.totalorder %v530_v55, 0  ;;  %v537_v3 = vand.u32 15, %v511_v58 }
  0x30   : > { %831 = vmatpush3.bf16.msra.mxu1 %v874_v29  ;;  %419 = vmatprep.subr.bf16.mxu0 %v876_v31  ;;  %v317_v47 = vpack.c.bf16 %v315_v45, %v314_v44  ;;  %v814_v6 = vsel %vm573_vm8, 1.0, %v905_v5  ;;  %v813_v9 = vsel %vm562_vm9, 1.0, %v905_v5  ;;  %vm560_vm11 = vcmp.gt.s32.totalorder %v516_v2, 0 }
  0x31   : > { %832 = vmatprep.subr.bf16.mxu1 %v878_v32  ;;  %834 = vmatprep.mubr.msk.bf16.mxu1 %vm398_vm6, %v316_v46  ;;  %vm575_vm12 = vcmp.lt.s32.totalorder %v537_v3, 15  ;;  %v812_v22 = vsel %vm560_vm11, 1.0, %v905_v5 }
  0x32   : > { %v815_v24 = vsel %vm575_vm12, 1.0, %v905_v5 }
  0x33   : > { %420 = vmatpush1.bf16.msra.mxu0 %v879_v41 }
  0x34   : > { %833 = vmatpush3.bf16.msra.mxu1 %v878_v32 }
  0x36   : > { %808 = vmatmul.mubr.msk.bf16.vlgmr.msra.gmra.mxu0 %vm398_vm6, %v316_v46 }
  0x37   : > { %835 = vmatmul.mubr.msk.bf16.vlgmr.msra.gmra.mxu1 %vm398_vm6, %v317_v47  ;;  %447 = vmatprep.mubr.bf16.mxu0 %v904_v23 }
  0x3e   : > { %809 = vmatmul.mubr.msk.bf16.gmra.mxu0 %vm398_vm6, %v317_v47 }
  0xf6   : > { %v439_v52 = vpop.f32.mrf.mxu0 }
  0xf7   : > { %v836_v53 = vpop.f32.mrf.mxu1  ;;  %v584_v61 = vrot.slane %v439_v52, 7 }
  0xf8   : > { %v441_v56 = vpop.f32.mrf.mxu0  ;;  %v603_v62 = vrot.slane %v836_v53, 1 }
  0xf9   : > { %v492_v57 = vpop.f32.mrf.mxu1 }
  0xfa   : > { %v443_v59 = vpop.f32.mrf.mxu0  ;;  %v601_v10 = vrot.slane %v492_v57, 1 }
  0xfb   : > { %v837_v60 = vpop.f32.mrf.mxu1  ;;  %v585_v63 = vrot.slane %v443_v59, 7 }
  0xfc   : > { %v445_v0 = vpop.f32.mrf.mxu0  ;;  %v604_v11 = vrot.slane %v837_v60, 1 }
  0xfd   : > { %v495_v1 = vpop.f32.mrf.mxu1  ;;  %v591_v4 = vsel %vm588_vm7, %v584_v61, %v585_v63 }
  0xfe   : > { %v602_v7 = vrot.slane %v495_v1, 1  ;;  %v449_v8 = vpop.f32.mrf.mxu0  ;;  %v598_v14 = vadd.f32 %v591_v4, %v445_v0  ;;  %v609_v21 = vsel %vm605_vm10, %v604_v11, %v601_v10  ;;  %v606_v27 = vsel %vm605_vm10, %v603_v62, %v604_v11 }
  0xff   : > { %v586_v13 = vrot.slane %v449_v8, 7  ;;  %v613_v33 = vmul.f32 %v815_v24, %v609_v21 }
 0x100   : > { %v607_v12 = vsel %vm605_vm10, %v602_v7, %v603_v62  ;;  %v451_v16 = vpop.f32.mrf.mxu0  ;;  %v608_v36 = vsel %vm605_vm10, %v601_v10, %v602_v7 }
 0x101   : > { %v611_v15 = vmul.f32 %v814_v6, %v607_v12  ;;  %v590_v17 = vsel %vm588_vm7, %v585_v63, %v586_v13 }
 0x102   : > { %v595_v19 = vmul.f32 %v813_v9, %v590_v17  ;;  %v453_v20 = vpop.f32.mrf.mxu0 }
 0x103   : > { %v615_v18 = vadd.f32 %v611_v15, %v598_v14  ;;  %v587_v23 = vrot.slane %v453_v20, 7 }
 0x104   : > { %v599_v25 = vadd.f32 %v595_v19, %v451_v16  ;;  %v455_v26 = vpop.f32.mrf.mxu0 }
 0x105   : > { %619 = vst.msk [vmem:[%s962_s29 + $0x8] sm:$0xff] %vm398_vm6, %v615_v18  ;;  %v592_v28 = vsel %vm588_vm7, %v587_v23, %v584_v61  ;;  %v589_v29 = vsel %vm588_vm7, %v586_v13, %v587_v23  ;;  %v623_v38 = vsel %vm398_vm6, %v615_v18, 0.0 }
 0x106   : > { %v616_v30 = vadd.f32 %v606_v27, %v599_v25  ;;  %v593_v31 = vmul.f32 %v812_v22, %v592_v28  ;;  %v600_v32 = vadd.f32 %v589_v29, %v455_v26 }
 0x108   : > { %620 = vst.msk [vmem:[%s962_s29 + $0x10] sm:$0xff] %vm398_vm6, %v616_v30  ;;  %v597_v34 = vadd.f32 %v593_v31, %v441_v56  ;;  %v617_v35 = vadd.f32 %v613_v33, %v600_v32  ;;  %v625_v41 = vsel %vm398_vm6, %v616_v30, 0.0 }
 0x10a   : > { %v614_v37 = vadd.f32 %v608_v36, %v597_v34  ;;  %621 = vst.msk [vmem:[%s962_s29 + $0x18] sm:$0xff] %vm398_vm6, %v617_v35  ;;  %v627_v43 = vsel %vm398_vm6, %v617_v35, 0.0 }
 0x10c   : > { %618 = vst.msk [vmem:[%s962_s29] sm:$0xff] %vm398_vm6, %v614_v37  ;;  %v622_v39 = vsel %vm398_vm6, %v614_v37, 0.0 }
 0x10d   : > { %v624_v40 = vadd.f32 %v623_v38, %v622_v39 }
 0x10f   : > { %v626_v42 = vadd.f32 %v625_v41, %v624_v40 }
 0x111   : > { %v628_v44 = vadd.f32 %v627_v43, %v626_v42 }
 0x113   : > { %v629_v45 = vrot.slane %v628_v44, 4 }
 0x115   : > { %v630_v46 = vadd.f32 %v629_v45, %v628_v44 }
 0x117   : > { %v631_v47 = vrot.slane %v630_v46, 2 }
 0x119   : > { %v632_v48 = vadd.f32 %v631_v47, %v630_v46 }
 0x11b   : > { %v633_v49 = vrot.slane %v632_v48, 1 }
 0x11d   : > { %v634_v50 = vadd.f32 %v633_v49, %v632_v48 }
 0x11f   : > { %v635_v51 = vmul.f32 0.03125, %v634_v50 }
 0x121   : > { %v636_v52 = vsub.f32 %v614_v37, %v635_v51  ;;  %v637_v53 = vsub.f32 %v615_v18, %v635_v51  ;;  %v638_v54 = vsub.f32 %v616_v30, %v635_v51  ;;  %v639_v55 = vsub.f32 %v617_v35, %v635_v51  ;;  %641 = vst.msk [vmem:[%s967_s6] sm:$0x1] %vm640_vm13, %v635_v51 }
 0x123   : > { %v642_v56 = vmul.f32 %v636_v52, %v636_v52  ;;  %v643_v57 = vmul.f32 %v637_v53, %v637_v53  ;;  %v644_v58 = vmul.f32 %v638_v54, %v638_v54  ;;  %v645_v59 = vmul.f32 %v639_v55, %v639_v55 }
 0x125   : > { %v646_v60 = vsel %vm398_vm6, %v642_v56, 0.0  ;;  %v647_v61 = vsel %vm398_vm6, %v643_v57, 0.0  ;;  %v649_v63 = vsel %vm398_vm6, %v644_v58, 0.0  ;;  %v651_v1 = vsel %vm398_vm6, %v645_v59, 0.0 }
 0x126   : > { %v648_v62 = vadd.f32 %v647_v61, %v646_v60 }
 0x128   : > { %v650_v0 = vadd.f32 %v649_v63, %v648_v62 }
 0x12a   : > { %v652_v2 = vadd.f32 %v651_v1, %v650_v0 }
 0x12c   : > { %v653_v3 = vrot.slane %v652_v2, 4 }
 0x12e   : > { %v654_v4 = vadd.f32 %v653_v3, %v652_v2 }
 0x130   : > { %v655_v5 = vrot.slane %v654_v4, 2 }
 0x132   : > { %v656_v6 = vadd.f32 %v655_v5, %v654_v4 }
 0x134   : > { %v657_v7 = vrot.slane %v656_v6, 1 }
 0x136   : > { %v658_v8 = vadd.f32 %v657_v7, %v656_v6 }
 0x138   : > { %659 = vst.msk [vmem:[%s967_s6 + $0x1] sm:$0x1] %vm640_vm13, %v658_v8 }
 0x139 PF: > { %s16_s19 = sadd.s32 1, %s902_s19   ;;  %s1053_s17 = smov %s898_s18 }
 0x13a   : > { %p13_p7 = scmp.ge.s32.totalorder %s16_s19, 10   ;;  %s1054_s18 = smov %s1056_s0 }
 0x13c   :  { %15 = sbr.rel (!%p13_p7) target bundleno = 2 (0x2), region = 82 }

// kernel: liaf_resblock_lif_forward.5
= control target key start
LH: loop header
LB: loop body
LE: loop exit
PB: predicated region body
PF: predicated region fallthrough
CT: control target
= control target key end

     0   :  { %s563_s20 = smov 0   ;;  %s565_s21 = smov 0   ;;  %s619_s0 = inlined_call_operand.<no memory space> [shape: f32[1], index: 0, kind: input, shape index: {}]   ;;  %s620_s1 = inlined_call_operand.vmem [shape: f32[8,16,128], index: 1, kind: input, shape index: {}]   ;;  %s621_s2 = inlined_call_operand.vmem [shape: f32[1,128], index: 2, kind: input, shape index: {}]   ;;  %s622_s3 = inlined_call_operand.vmem [shape: f32[1,128], index: 3, kind: input, shape index: {}]   ;;  %s623_s4 = inlined_call_operand.vmem [shape: f32[8,16,128], index: 4, kind: input, shape index: {}]   ;;  %s624_s5 = inlined_call_operand.vmem [shape: f32[8,16,128], index: 5, kind: output, shape index: {}]  }
   0x1   :  { %10 = sst [smem:[#allocation3]] %s619_s0  ;;  %s567_s22 = smov 0  }
   0x2 LB: > { %s25_s0 = sadd.s32 1, %s524_s21  ;;  %p466_p0 = scmp.ge.s32.totalorder %s528_s22, 1  ;;  %s528_s22 = sphi %s567_s22, %s16_s22   ;;  %s524_s21 = sphi %s565_s21, %s626_s21   ;;  %s520_s20 = sphi %s563_s20, %s625_s20  }
   0x3   : > { %p26_p1 = scmp.ge.s32.totalorder %s25_s0, 8  ;;  %p226_p2 = scmp.lt.s32.totalorder %s528_s22, 9 }
   0x5   : > { %s628_s0 = smov (%p26_p1, %s25_s0), 0  ;;  %p227_p3 = pnand %p466_p0, %p226_p2 }
   0x6   : > { %p272_p4 = scmp.lt.s32.totalorder (!%p227_p3), %s520_s20, 7  ;;  %s321_s23 = sld [smem:[#allocation3]] (!%p227_p3) }
   0x7   : > { %230 = sbr.rel (%p227_p3) target bundleno = 51 (0x33), region = 40  ;;  %p475_p5 = scmp.ne.s32.totalorder (!%p227_p3), %s520_s20, 0 }
   0xc   : > { %s273_s24 = scalar_select %p272_p4, %s520_s20, 7  ;;  %v473_v0 = vld [vmem:[%s621_s2] ss:$0 sm:$0xff] }
   0xd   : > { %v474_v3 = vld [vmem:[%s622_s3] ss:$0 sm:$0xff] }
   0xe   : > { %s479_s25 = sshll.u32 %s273_s24, 4 }
   0xf   : > { %s279_s30 = scalar_lea.vmem %s620_s1, %s479_s25  ;;  %s594_s8 = scalar_lea.vmem %s623_s4, %s479_s25 }
  0x10   : > { %s599_s11 = scalar_lea.vmem %s624_s5, %s479_s25  ;;  %v301_v1 = vld [vmem:[%s279_s30] sm:$0xff]  ;;  %v302_v2 = vld [vmem:[%s279_s30 + $0x8] sm:$0xff]  ;;  %325 = sbr.rel (%p475_p5) target bundleno = 22 (0x16), region = 44 }
  0x11   : > { %v310_v4 = vmul.f32 %v473_v0, %v301_v1  ;;  %v311_v5 = vmul.f32 %v473_v0, %v302_v2 }
  0x13   : > { %v319_v6 = vadd.f32 %v474_v3, %v310_v4  ;;  %v320_v7 = vadd.f32 %v474_v3, %v311_v5 }
  0x15   : > { %326 = vst [vmem:[#allocation2] sm:$0xff] %v319_v6  ;;  %327 = vst [vmem:[#allocation2 + $0x8] sm:$0xff] %v320_v7 }
  0x16 PF: > { %p476_p6 = scmp.le.s32.totalorder %s520_s20, 0 }
  0x18   : > { %331 = sbr.rel (%p476_p6) target bundleno = 37 (0x25), region = 48 }
  0x1d   : > { %v332_v8 = vld [vmem:[#allocation2] sm:$0xff]  ;;  %v336_v9 = vstv %s321_s23  ;;  %v333_v10 = vld [vmem:[#allocation2 + $0x8] sm:$0xff] }
  0x1e   : > { %vm334_vm0 = vcmp.gt.f32.partialorder %v332_v8, 0.5  ;;  %vm335_vm1 = vcmp.gt.f32.partialorder %v333_v10, 0.5 }
  0x1f   : > { %v337_v11 = vsel %vm334_vm0, 0.0, %v336_v9  ;;  %v338_v12 = vsel %vm335_vm1, 0.0, %v336_v9 }
  0x20   : > { %v339_v13 = vmul.f32 %v337_v11, %v332_v8  ;;  %v340_v14 = vmul.f32 %v338_v12, %v333_v10 }
  0x22   : > { %v341_v15 = vadd.f32 %v339_v13, %v319_v6  ;;  %v342_v16 = vadd.f32 %v340_v14, %v320_v7 }
  0x24   : > { %343 = vst [vmem:[#allocation2] sm:$0xff] %v341_v15  ;;  %344 = vst [vmem:[#allocation2 + $0x8] sm:$0xff] %v342_v16 }
  0x25 PF: > { %v351_v21 = vld [vmem:[%s594_s8] sm:$0xff]  ;;  %v352_v22 = vld [vmem:[%s594_s8 + $0x8] sm:$0xff] }
  0x2b   : > { %v345_v17 = vld [vmem:[#allocation2] sm:$0xff]  ;;  %v346_v18 = vld [vmem:[#allocation2 + $0x8] sm:$0xff] }
  0x2c   : > { %v347_v19 = vmax.f32 %v345_v17, 0.0  ;;  %v348_v20 = vmax.f32 %v346_v18, 0.0 }
  0x2e   : > { %v349_v23 = vmin.f32 %v347_v19, 1.0  ;;  %v350_v24 = vmin.f32 %v348_v20, 1.0 }
  0x30   : > { %v353_v25 = vadd.f32 %v351_v21, %v349_v23  ;;  %v354_v26 = vadd.f32 %v352_v22, %v350_v24 }
  0x32   : > { %355 = vst [vmem:[%s599_s11] sm:$0xff] %v353_v25  ;;  %356 = vst [vmem:[%s599_s11 + $0x8] sm:$0xff] %v354_v26 }
  0x33 PF: > { %s16_s22 = sadd.s32 1, %s528_s22   ;;  %s625_s20 = smov %s524_s21 }
  0x34   : > { %p13_p7 = scmp.ge.s32.totalorder %s16_s22, 10   ;;  %s626_s21 = smov %s628_s0 }
  0x36   :  { %15 = sbr.rel (!%p13_p7) target bundleno = 2 (0x2), region = 81 }

// kernel: liaf_resblock_lif_forward.4
= control target key start
LH: loop header
LB: loop body
LE: loop exit
PB: predicated region body
PF: predicated region fallthrough
CT: control target
= control target key end

     0   :  { %12 = vsyncpa [#allocation5], 0  ;;  %s1130_s21 = smov 0   ;;  %s1132_s22 = smov 0   ;;  %s1283_s0 = inlined_call_operand.vmem [shape: f32[2], index: 0, kind: input, shape index: {}]   ;;  %s1284_s1 = inlined_call_operand.vmem [shape: f32[8,32,64], index: 1, kind: input, shape index: {}]   ;;  %s1285_s2 = inlined_call_operand.vmem [shape: f32[1,64], index: 2, kind: input, shape index: {}]   ;;  %s1286_s3 = inlined_call_operand.vmem [shape: f32[1,64], index: 3, kind: input, shape index: {}]   ;;  %s1287_s4 = inlined_call_operand.vmem [shape: bf16[64,384], index: 4, kind: input, shape index: {}]   ;;  %s1288_s5 = inlined_call_operand.vmem [shape: f32[8,32,64], index: 5, kind: output, shape index: {0}]   ;;  %s1289_s6 = inlined_call_operand.vmem [shape: f32[8,2,64], index: 6, kind: output, shape index: {1}]  }
   0x1   :  { %s1134_s23 = smov 0  }
   0x2 LB: > { %s935_s24 = sadd.s32 4294967295, %s1090_s23   ;;  %s27_s25 = sadd.s32 1, %s1086_s22  ;;  %s1090_s23 = sphi %s1134_s23, %s18_s23   ;;  %s1086_s22 = sphi %s1132_s22, %s1293_s22   ;;  %s1082_s21 = sphi %s1130_s21, %s1292_s21  }
   0x3   : > { %p28_p0 = scmp.ge.s32.totalorder %s27_s25, 8  ;;  %p937_p1 = scmp.ge.s32.totalorder %s1090_s23, 1 }
   0x4   : > { %p205_p2 = scmp.lt.s32.totalorder %s1090_s23, 9  ;;  %p1155_p4 = scmp.eq.s32.totalorder %s935_s24, 0 }
   0x5   : > { %s1295_s25 = smov (%p28_p0, %s27_s25), 0  ;;  %s218_s30 = sshll.u32 %s1283_s0, 4  ;;  %s219_s30 = int_to_ptr.vmem [resolvable:$true] %s218_s30 }
   0x6   : > { %p1151_p3 = pnand %p937_p1, %p205_p2  ;;  %s1049_s7 = scalar_lea.vmem %s219_s30, 16 }
   0x7   : > { %p1050_p7 = scmp.ne.s32.totalorder %s219_s30, %s1049_s7  ;;  %p1057_p11 = scmp.lt.s32.totalorder %s219_s30, %s219_s30 }
   0x8   : > { %p1000_p5 = pneg %p1151_p3  ;;  %p1058_p12 = scmp.lt.s32.totalorder %s1049_s7, %s1049_s7 }
   0xa   : > { %p1001_p6 = pnand %p1155_p4, %p1000_p5  ;;  %p1059_p13 = por %p1058_p12, %p1057_p11 }
   0xc   : > { %p1051_p8 = pneg %p1001_p6 }
   0xe   : > { %p1052_p9 = pnand %p1051_p8, %p1050_p7 }
  0x10   : > { %p1053_p10 = pneg %p1052_p9 }
  0x12   : > { %p1060_p0 = pnand %p1059_p13, %p1053_p10 }
  0x14   : > { %1063 = shalt.err (!%p1060_p0)
}
  0x15   : > { %s1092_s8 = smov [#allocation4]   ;;  %253 = sbr.rel (%p1151_p3) target bundleno = 362 (0x16a), region = 40 }
  0x16   : > { %1003 = dma.vmem_to_smem (!%p1001_p6), %s219_s30, 16, %s1092_s8, [#allocation5]  }
  0x1a   : > { %1077 = dma.done.wait (%p1155_p4), [#allocation5], 16  }
  0x1b   : > { %1079 = vsyncadd (%p1155_p4), [#allocation5], 4294967280 }
  0x1c   : > { %259 = sfence }
  0x1d   : > { %p299_p1 = scmp.lt.s32.totalorder %s1082_s21, 7  ;;  %s1173_s9 = sld [smem:[#allocation4]]  ;;  %v947_v0 = vld [vmem:[%s1285_s2] ss:$0 sm:$0xff] }
  0x1e   : > { %v948_v1 = vld [vmem:[%s1286_s3] ss:$0 sm:$0xff]  ;;  %p949_p2 = scmp.ne.s32.totalorder %s1082_s21, 0 }
  0x1f   : > { %s300_s10 = scalar_select %p299_p1, %s1082_s21, 7 }
  0x21   : > { %s976_s11 = sshll.u32 %s300_s10, 5  ;;  %s946_s12 = sshll.u32 %s300_s10, 1 }
  0x22   : > { %s306_s17 = scalar_lea.vmem %s1284_s1, %s976_s11  ;;  %s1185_s20 = scalar_lea.vmem %s1288_s5, %s976_s11 }
  0x23   : > { %s1193_s29 = scalar_lea.vmem %s1289_s6, %s946_s12  ;;  %v327_v2 = vld [vmem:[%s306_s17] sm:$0xff]  ;;  %v328_v3 = vld [vmem:[%s306_s17 + $0x8] sm:$0xff]  ;;  %v329_v4 = vld [vmem:[%s306_s17 + $0x10] sm:$0xff]  ;;  %357 = sbr.rel (%p949_p2) target bundleno = 43 (0x2b), region = 48 }
  0x24   : > { %v330_v5 = vld [vmem:[%s306_s17 + $0x18] sm:$0xff]  ;;  %v338_v6 = vmul.f32 %v947_v0, %v327_v2  ;;  %v339_v7 = vmul.f32 %v947_v0, %v328_v3  ;;  %v340_v8 = vmul.f32 %v947_v0, %v329_v4 }
  0x25   : > { %v341_v9 = vmul.f32 %v947_v0, %v330_v5 }
  0x26   : > { %v349_v10 = vadd.f32 %v948_v1, %v338_v6  ;;  %v350_v11 = vadd.f32 %v948_v1, %v339_v7  ;;  %v351_v12 = vadd.f32 %v948_v1, %v340_v8 }
  0x27   : > { %v352_v13 = vadd.f32 %v948_v1, %v341_v9 }
  0x28   : > { %vm358_vm0 = vcmask 523264  }
  0x29   : > { %359 = vst.msk [vmem:[#allocation2] sm:$0xff] %vm358_vm0, %v349_v10  ;;  %360 = vst.msk [vmem:[#allocation2 + $0x8] sm:$0xff] %vm358_vm0, %v350_v11 }
  0x2a   : > { %361 = vst.msk [vmem:[#allocation2 + $0x10] sm:$0xff] %vm358_vm0, %v351_v12  ;;  %362 = vst.msk [vmem:[#allocation2 + $0x18] sm:$0xff] %vm358_vm0, %v352_v13 }
  0x2b PF: > { %p950_p3 = scmp.le.s32.totalorder %s1082_s21, 0 }
  0x2d   : > { %366 = sbr.rel (%p950_p3) target bundleno = 59 (0x3b), region = 52 }
  0x32   : > { %v367_v14 = vld [vmem:[#allocation2] sm:$0xff]  ;;  %v375_v15 = vstv %s1173_s9  ;;  %v368_v16 = vld [vmem:[#allocation2 + $0x8] sm:$0xff]  ;;  %v369_v17 = vld [vmem:[#allocation2 + $0x10] sm:$0xff]  ;;  %vm388_vm5 = vcmask 523264  }
  0x33   : > { %vm371_vm1 = vcmp.gt.f32.partialorder %v367_v14, 0.5  ;;  %vm372_vm2 = vcmp.gt.f32.partialorder %v368_v16, 0.5  ;;  %vm373_vm3 = vcmp.gt.f32.partialorder %v369_v17, 0.5  ;;  %v370_v18 = vld [vmem:[#allocation2 + $0x18] sm:$0xff] }
  0x34   : > { %v376_v19 = vsel %vm371_vm1, 0.0, %v375_v15  ;;  %v377_v20 = vsel %vm372_vm2, 0.0, %v375_v15  ;;  %v378_v21 = vsel %vm373_vm3, 0.0, %v375_v15  ;;  %vm374_vm4 = vcmp.gt.f32.partialorder %v370_v18, 0.5 }
  0x35   : > { %v380_v22 = vmul.f32 %v376_v19, %v367_v14  ;;  %v381_v23 = vmul.f32 %v377_v20, %v368_v16  ;;  %v382_v24 = vmul.f32 %v378_v21, %v369_v17  ;;  %v379_v25 = vsel %vm374_vm4, 0.0, %v375_v15 }
  0x36   : > { %v383_v26 = vmul.f32 %v379_v25, %v370_v18 }
  0x37   : > { %v384_v27 = vadd.f32 %v380_v22, %v349_v10  ;;  %v385_v28 = vadd.f32 %v381_v23, %v350_v11  ;;  %v386_v29 = vadd.f32 %v382_v24, %v351_v12 }
  0x38   : > { %v387_v30 = vadd.f32 %v383_v26, %v352_v13 }
  0x39   : > { %389 = vst.msk [vmem:[#allocation2] sm:$0xff] %vm388_vm5, %v384_v27  ;;  %390 = vst.msk [vmem:[#allocation2 + $0x8] sm:$0xff] %vm388_vm5, %v385_v28 }
  0x3a   : > { %391 = vst.msk [vmem:[#allocation2 + $0x10] sm:$0xff] %vm388_vm5, %v386_v29  ;;  %392 = vst.msk [vmem:[#allocation2 + $0x18] sm:$0xff] %vm388_vm5, %v387_v30 }
  0x3b PF: > { %s951_s30 = sld [smem:[#allocation4 + $0x1]] }
  0x40   : > { %v393_v31 = vld [vmem:[#allocation2] sm:$0xff]  ;;  %v394_v32 = vld [vmem:[#allocation2 + $0x8] sm:$0xff]  ;;  %408 = sbr.rel (%p949_p2) target bundleno = 72 (0x48), region = 56 }
  0x41   : > { %v395_v33 = vld [vmem:[#allocation2 + $0x10] sm:$0xff]  ;;  %v396_v34 = vld [vmem:[#allocation2 + $0x18] sm:$0xff]  ;;  %v397_v35 = vmax.f32 %v393_v31, 0.0  ;;  %v398_v36 = vmax.f32 %v394_v32, 0.0 }
  0x42   : > { %v399_v37 = vmax.f32 %v395_v33, 0.0  ;;  %v400_v38 = vmax.f32 %v396_v34, 0.0 }
  0x43   : > { %v401_v39 = vmin.f32 %v397_v35, 1.0  ;;  %v402_v40 = vmin.f32 %v398_v36, 1.0 }
  0x44   : > { %v403_v41 = vmin.f32 %v399_v37, 1.0  ;;  %v404_v42 = vmin.f32 %v400_v38, 1.0 }
  0x45   : > { %vm409_vm6 = vcmask 523264  }
  0x46   : > { %410 = vst.msk [vmem:[#allocation3] sm:$0xff] %vm409_vm6, %v401_v39  ;;  %411 = vst.msk [vmem:[#allocation3 + $0x8] sm:$0xff] %vm409_vm6, %v402_v40 }
  0x47   : > { %412 = vst.msk [vmem:[#allocation3 + $0x10] sm:$0xff] %vm409_vm6, %v403_v41  ;;  %413 = vst.msk [vmem:[#allocation3 + $0x18] sm:$0xff] %vm409_vm6, %v404_v42 }
  0x48 PF: > { %416 = sbr.rel (%p950_p3) target bundleno = 86 (0x56), region = 60 }
  0x4d   : > { %v417_v43 = vld [vmem:[#allocation3] sm:$0xff]  ;;  %v425_v44 = vstv %s951_s30  ;;  %v418_v45 = vld [vmem:[#allocation3 + $0x8] sm:$0xff]  ;;  %vm438_vm11 = vcmask 523264  }
  0x4e   : > { %v419_v46 = vld [vmem:[#allocation3 + $0x10] sm:$0xff]  ;;  %vm421_vm7 = vcmp.gt.f32.partialorder %v417_v43, 0.5  ;;  %vm422_vm8 = vcmp.gt.f32.partialorder %v418_v45, 0.5  ;;  %v420_v47 = vld [vmem:[#allocation3 + $0x18] sm:$0xff] }
  0x4f   : > { %vm423_vm9 = vcmp.gt.f32.partialorder %v419_v46, 0.5  ;;  %v426_v48 = vsel %vm421_vm7, 0.0, %v425_v44  ;;  %v427_v49 = vsel %vm422_vm8, 0.0, %v425_v44  ;;  %vm424_vm10 = vcmp.gt.f32.partialorder %v420_v47, 0.5 }
  0x50   : > { %v428_v50 = vsel %vm423_vm9, 0.0, %v425_v44  ;;  %v430_v51 = vmul.f32 %v426_v48, %v417_v43  ;;  %v431_v52 = vmul.f32 %v427_v49, %v418_v45  ;;  %v429_v54 = vsel %vm424_vm10, 0.0, %v425_v44 }
  0x51   : > { %v432_v53 = vmul.f32 %v428_v50, %v419_v46  ;;  %v433_v55 = vmul.f32 %v429_v54, %v420_v47 }
  0x52   : > { %v434_v56 = vadd.f32 %v430_v51, %v401_v39  ;;  %v435_v57 = vadd.f32 %v431_v52, %v402_v40 }
  0x53   : > { %v436_v58 = vadd.f32 %v432_v53, %v403_v41  ;;  %v437_v59 = vadd.f32 %v433_v55, %v404_v42 }
  0x54   : > { %439 = vst.msk [vmem:[#allocation3] sm:$0xff] %vm438_vm11, %v434_v56  ;;  %440 = vst.msk [vmem:[#allocation3 + $0x8] sm:$0xff] %vm438_vm11, %v435_v57 }
  0x55   : > { %441 = vst.msk [vmem:[#allocation3 + $0x10] sm:$0xff] %vm438_vm11, %v436_v58  ;;  %442 = vst.msk [vmem:[#allocation3 + $0x18] sm:$0xff] %vm438_vm11, %v437_v59 }
  0x56 PF: > { %v1033_v60 = vld [vmem:[%s1287_s4 + $0x4c] ss:$12 sps:$4 sm:$0xff]   ;;  %v1035_v61 = vld [vmem:[%s1287_s4 + $0x50] ss:$12 sps:$4 sm:$0xff]   ;;  %v1093_v62 = vmov 0   ;;  %vm537_vm12 = vcmask 523264   ;;  %v646_v23 = vlaneseq }
  0x57   : > { %576 = vmatprep.mubr.bf16.mxu0 %v1093_v62  ;;  %552 = vmatprep.subr.bf16.mxu0 %v1033_v60  ;;  %v1036_v63 = vld [vmem:[%s1287_s4 + $0x48] ss:$12 sps:$4 sm:$0xff]   ;;  %v1039_v1 = vld [vmem:[%s1287_s4 + $0x38] ss:$12 sps:$4 sm:$0xff]   ;;  %v1040_v2 = vld [vmem:[%s1287_s4 + $0x30] ss:$12 sps:$4 sm:$0xff]  }
  0x58   : > { %984 = vmatprep.subr.bf16.mxu1 %v1035_v61  ;;  %v1037_v0 = vld [vmem:[%s1287_s4 + $0x34] ss:$12 sps:$4 sm:$0xff]   ;;  %553 = vmatpush1.bf16.msra.mxu0 %v1036_v63  ;;  %v1041_v3 = vld [vmem:[%s1287_s4 + $0x1c] ss:$12 sps:$4 sm:$0xff]   ;;  %v1044_v5 = vld [vmem:[%s1287_s4 + $0x18] ss:$12 sps:$4 sm:$0xff]  }
  0x59   : > { %985 = vmatpush3.bf16.msra.mxu1 %v1035_v61  ;;  %554 = vmatprep.subr.bf16.mxu0 %v1037_v0  ;;  %v1043_v4 = vld [vmem:[%s1287_s4 + $0x20] ss:$12 sps:$4 sm:$0xff]   ;;  %v1045_v6 = vld [vmem:[%s1287_s4 + $0x4] ss:$12 sps:$4 sm:$0xff]   ;;  %v1047_v7 = vld [vmem:[%s1287_s4 + $0x8] ss:$12 sps:$4 sm:$0xff]  }
  0x5a   : > { %986 = vmatprep.subr.bf16.mxu1 %v1039_v1  ;;  %v1048_v16 = vld [vmem:[%s1287_s4] ss:$12 sps:$4 sm:$0xff]   ;;  %v647_v24 = vshrl.u32 %v646_v23, 7  ;;  %v1094_v44 = vmov 0.0   ;;  %vm779_vm3 = vcmask 516096  }
  0x5b   : > { %v443_v8 = vld [vmem:[#allocation3] sm:$0xff]  ;;  %v444_v9 = vld [vmem:[#allocation3 + $0x8] sm:$0xff] }
  0x5c   : > { %555 = vmatpush1.bf16.msra.mxu0 %v1040_v2  ;;  %v447_v10 = vmax.f32 %v443_v8, 0.0  ;;  %v448_v11 = vmax.f32 %v444_v9, 0.0  ;;  %v445_v12 = vld [vmem:[#allocation3 + $0x10] sm:$0xff]  ;;  %v446_v13 = vld [vmem:[#allocation3 + $0x18] sm:$0xff]  ;;  %v648_v25 = vadd.s32 8, %v647_v24  ;;  %v649_v26 = vadd.s32 16, %v647_v24 }
  0x5d   : > { %987 = vmatpush3.bf16.msra.mxu1 %v1039_v1  ;;  %556 = vmatprep.subr.bf16.mxu0 %v1041_v3  ;;  %v449_v14 = vmax.f32 %v445_v12, 0.0  ;;  %v450_v15 = vmax.f32 %v446_v13, 0.0  ;;  %v650_v33 = vadd.s32 24, %v647_v24  ;;  %vm727_vm13 = vcmp.lt.s32.totalorder %v647_v24, 1 }
  0x5e   : > { %988 = vmatprep.subr.bf16.mxu1 %v1043_v4  ;;  %v451_v17 = vmin.f32 %v447_v10, 1.0  ;;  %v452_v18 = vmin.f32 %v448_v11, 1.0  ;;  %v662_v29 = vand.u32 15, %v648_v25  ;;  %v669_v30 = vand.u32 15, %v649_v26 }
  0x5f   : > { %v453_v19 = vmin.f32 %v449_v14, 1.0  ;;  %v454_v20 = vmin.f32 %v450_v15, 1.0  ;;  %vm744_vm0 = vcmp.lt.s32.totalorder %v647_v24, 7  ;;  %v655_v41 = vand.u32 15, %v647_v24 }
  0x60   : > { %557 = vmatpush1.bf16.msra.mxu0 %v1044_v5  ;;  %v455_v21 = vpack.c.bf16 %v452_v18, %v451_v17  ;;  %vm712_vm14 = vcmp.lt.s32.totalorder %v662_v29, 15  ;;  %vm701_vm15 = vcmp.gt.s32.totalorder %v669_v30, 0  ;;  %v676_v42 = vand.u32 15, %v650_v33 }
  0x61   : > { %989 = vmatpush3.bf16.msra.mxu1 %v1043_v4  ;;  %558 = vmatprep.subr.bf16.mxu0 %v1045_v6  ;;  %v456_v22 = vpack.c.bf16 %v454_v20, %v453_v19  ;;  %v972_v45 = vsel %vm712_vm14, 1.0, %v1094_v44  ;;  %v971_v48 = vsel %vm701_vm15, 1.0, %v1094_v44  ;;  %vm699_vm1 = vcmp.gt.s32.totalorder %v655_v41, 0 }
  0x62   : > { %990 = vmatprep.subr.bf16.mxu1 %v1047_v7  ;;  %992 = vmatprep.mubr.msk.bf16.mxu1 %vm537_vm12, %v455_v21  ;;  %vm714_vm2 = vcmp.lt.s32.totalorder %v676_v42, 15  ;;  %v970_v61 = vsel %vm699_vm1, 1.0, %v1094_v44 }
  0x63   : > { %v973_v63 = vsel %vm714_vm2, 1.0, %v1094_v44 }
  0x64   : > { %559 = vmatpush1.bf16.msra.mxu0 %v1048_v16 }
  0x65   : > { %991 = vmatpush3.bf16.msra.mxu1 %v1047_v7 }
  0x67   : > { %966 = vmatmul.mubr.msk.bf16.vlgmr.msra.gmra.mxu0 %vm537_vm12, %v455_v21 }
  0x68   : > { %993 = vmatmul.mubr.msk.bf16.vlgmr.msra.gmra.mxu1 %vm537_vm12, %v456_v22  ;;  %586 = vmatprep.mubr.bf16.mxu0 %v1093_v62 }
  0x6f   : > { %967 = vmatmul.mubr.msk.bf16.gmra.mxu0 %vm537_vm12, %v456_v22 }
 0x127   : > { %v578_v27 = vpop.f32.mrf.mxu0 }
 0x128   : > { %v994_v28 = vpop.f32.mrf.mxu1  ;;  %v723_v36 = vrot.slane %v578_v27, 7 }
 0x129   : > { %v580_v31 = vpop.f32.mrf.mxu0  ;;  %v742_v37 = vrot.slane %v994_v28, 1 }
 0x12a   : > { %v631_v32 = vpop.f32.mrf.mxu1 }
 0x12b   : > { %v582_v34 = vpop.f32.mrf.mxu0  ;;  %v740_v49 = vrot.slane %v631_v32, 1 }
 0x12c   : > { %v995_v35 = vpop.f32.mrf.mxu1  ;;  %v724_v38 = vrot.slane %v582_v34, 7 }
 0x12d   : > { %v584_v39 = vpop.f32.mrf.mxu0  ;;  %v743_v50 = vrot.slane %v995_v35, 1 }
 0x12e   : > { %v634_v40 = vpop.f32.mrf.mxu1  ;;  %v730_v43 = vsel %vm727_vm13, %v723_v36, %v724_v38 }
 0x12f   : > { %v741_v46 = vrot.slane %v634_v40, 1  ;;  %v588_v47 = vpop.f32.mrf.mxu0  ;;  %v737_v53 = vadd.f32 %v730_v43, %v584_v39  ;;  %v748_v60 = vsel %vm744_vm0, %v743_v50, %v740_v49  ;;  %v745_v2 = vsel %vm744_vm0, %v742_v37, %v743_v50 }
 0x130   : > { %v725_v52 = vrot.slane %v588_v47, 7  ;;  %v752_v8 = vmul.f32 %v973_v63, %v748_v60 }
 0x131   : > { %v746_v51 = vsel %vm744_vm0, %v741_v46, %v742_v37  ;;  %v590_v55 = vpop.f32.mrf.mxu0  ;;  %v747_v11 = vsel %vm744_vm0, %v740_v49, %v741_v46 }
 0x132   : > { %v750_v54 = vmul.f32 %v972_v45, %v746_v51  ;;  %v729_v56 = vsel %vm727_vm13, %v724_v38, %v725_v52 }
 0x133   : > { %v734_v58 = vmul.f32 %v971_v48, %v729_v56  ;;  %v592_v59 = vpop.f32.mrf.mxu0 }
 0x134   : > { %v754_v57 = vadd.f32 %v750_v54, %v737_v53  ;;  %v726_v62 = vrot.slane %v592_v59, 7 }
 0x135   : > { %v738_v0 = vadd.f32 %v734_v58, %v590_v55  ;;  %v594_v1 = vpop.f32.mrf.mxu0 }
 0x136   : > { %758 = vst.msk [vmem:[%s1185_s20 + $0x8] sm:$0xff] %vm537_vm12, %v754_v57  ;;  %v731_v3 = vsel %vm727_vm13, %v726_v62, %v723_v36  ;;  %v728_v4 = vsel %vm727_vm13, %v725_v52, %v726_v62  ;;  %v762_v13 = vsel %vm537_vm12, %v754_v57, 0.0 }
 0x137   : > { %v755_v5 = vadd.f32 %v745_v2, %v738_v0  ;;  %v732_v6 = vmul.f32 %v970_v61, %v731_v3  ;;  %v739_v7 = vadd.f32 %v728_v4, %v594_v1 }
 0x139   : > { %759 = vst.msk [vmem:[%s1185_s20 + $0x10] sm:$0xff] %vm537_vm12, %v755_v5  ;;  %v736_v9 = vadd.f32 %v732_v6, %v580_v31  ;;  %v756_v10 = vadd.f32 %v752_v8, %v739_v7  ;;  %v764_v16 = vsel %vm537_vm12, %v755_v5, 0.0 }
 0x13b   : > { %v753_v12 = vadd.f32 %v747_v11, %v736_v9  ;;  %760 = vst.msk [vmem:[%s1185_s20 + $0x18] sm:$0xff] %vm537_vm12, %v756_v10  ;;  %v766_v18 = vsel %vm537_vm12, %v756_v10, 0.0 }
 0x13d   : > { %757 = vst.msk [vmem:[%s1185_s20] sm:$0xff] %vm537_vm12, %v753_v12  ;;  %v761_v14 = vsel %vm537_vm12, %v753_v12, 0.0 }
 0x13e   : > { %v763_v15 = vadd.f32 %v762_v13, %v761_v14 }
 0x140   : > { %v765_v17 = vadd.f32 %v764_v16, %v763_v15 }
 0x142   : > { %v767_v19 = vadd.f32 %v766_v18, %v765_v17 }
 0x144   : > { %v768_v20 = vrot.slane %v767_v19, 4 }
 0x146   : > { %v769_v21 = vadd.f32 %v768_v20, %v767_v19 }
 0x148   : > { %v770_v22 = vrot.slane %v769_v21, 2 }
 0x14a   : > { %v771_v23 = vadd.f32 %v770_v22, %v769_v21 }
 0x14c   : > { %v772_v24 = vrot.slane %v771_v23, 1 }
 0x14e   : > { %v773_v25 = vadd.f32 %v772_v24, %v771_v23 }
 0x150   : > { %v774_v26 = vmul.f32 0.03125, %v773_v25 }
 0x152   : > { %v775_v27 = vsub.f32 %v753_v12, %v774_v26  ;;  %v776_v28 = vsub.f32 %v754_v57, %v774_v26  ;;  %v777_v29 = vsub.f32 %v755_v5, %v774_v26  ;;  %v778_v30 = vsub.f32 %v756_v10, %v774_v26  ;;  %780 = vst.msk [vmem:[%s1193_s29] sm:$0x1] %vm779_vm3, %v774_v26 }
 0x154   : > { %v781_v31 = vmul.f32 %v775_v27, %v775_v27  ;;  %v782_v32 = vmul.f32 %v776_v28, %v776_v28  ;;  %v783_v33 = vmul.f32 %v777_v29, %v777_v29  ;;  %v784_v34 = vmul.f32 %v778_v30, %v778_v30 }
 0x156   : > { %v785_v35 = vsel %vm537_vm12, %v781_v31, 0.0  ;;  %v786_v36 = vsel %vm537_vm12, %v782_v32, 0.0  ;;  %v788_v38 = vsel %vm537_vm12, %v783_v33, 0.0  ;;  %v790_v40 = vsel %vm537_vm12, %v784_v34, 0.0 }
 0x157   : > { %v787_v37 = vadd.f32 %v786_v36, %v785_v35 }
 0x159   : > { %v789_v39 = vadd.f32 %v788_v38, %v787_v37 }
 0x15b   : > { %v791_v41 = vadd.f32 %v790_v40, %v789_v39 }
 0x15d   : > { %v792_v42 = vrot.slane %v791_v41, 4 }
 0x15f   : > { %v793_v43 = vadd.f32 %v792_v42, %v791_v41 }
 0x161   : > { %v794_v44 = vrot.slane %v793_v43, 2 }
 0x163   : > { %v795_v45 = vadd.f32 %v794_v44, %v793_v43 }
 0x165   : > { %v796_v46 = vrot.slane %v795_v45, 1 }
 0x167   : > { %v797_v47 = vadd.f32 %v796_v46, %v795_v45 }
 0x169   : > { %798 = vst.msk [vmem:[%s1193_s29 + $0x1] sm:$0x1] %vm779_vm3, %v797_v47 }
 0x16a PF: > { %s18_s23 = sadd.s32 1, %s1090_s23   ;;  %s1292_s21 = smov %s1086_s22 }
 0x16b   : > { %p15_p4 = scmp.ge.s32.totalorder %s18_s23, 10   ;;  %s1293_s22 = smov %s1295_s25 }
 0x16d   :  { %17 = sbr.rel (!%p15_p4) target bundleno = 2 (0x2), region = 103 }
 0x172   :  { %849 = vsyncpa [#allocation5], 1 }
 0x173   :  { %851 = vsyncpa [#allocation5 + $0x1], 1 }

</bundles_post_ra>
